<compile_context>
chip_gen: v5e
topology: v5e:2x2
jax: 0.10.0
libtpu: 0.0.40
codegen_flags: <defaults>
</compile_context>

<pallas_src>
import functools

import jax
import jax.numpy as jnp
from jax import lax
from jax.experimental import pallas as pl
from jax.experimental.pallas import tpu as pltpu


# ---------------------------------------------------------------------------
# Linear (head1):  out = x @ W^T + b
# ---------------------------------------------------------------------------
def _linear_kernel(x_ref, w_ref, b_ref, o_ref):
    o_ref[...] = (
        jnp.dot(x_ref[...], w_ref[...], preferred_element_type=jnp.float32)
        + b_ref[...]
    ).astype(o_ref.dtype)


def linear(x, w_t, b):
    # x: (B, Cin), w_t: (Cin, Cout), b: (Cout,)
    B, _ = x.shape
    Cout = w_t.shape[1]
    return pl.pallas_call(
        _linear_kernel,
        out_shape=jax.ShapeDtypeStruct((B, Cout), jnp.float32),
    )(x, w_t, b.reshape(1, Cout))


# ---------------------------------------------------------------------------
# Fused kernel: 2x nearest upsample along H  +  3x3 conv (pad=1)  +  ReLU
# (+ optional fused 1x1 projection epilogue for the last decoder stage).
#
# Input layout is NHCW with the image already 2x-upsampled along W and zero
# padded by one row at the top/bottom:  x_ref block = (Hin+2, Cin, Wout).
# The H-upsample is folded into the pre-combined weights (see
# combine_up2_weights): for low-res row i the kernel emits output rows 2i and
# 2i+1 with a single (16, 24) @ (24, Wout) dot per contributing input row.
# Column taps (dx = -1, 0, +1) are built with pltpu.roll + a one-column edge
# mask so W stays lane-aligned (no 514-wide padding).
# ---------------------------------------------------------------------------
def _up2_conv3x3_kernel(x_ref, w_ref, b_ref, *rest, th, project):
    if project:
        wf_ref, bf_ref, o_ref = rest
    else:
        (o_ref,) = rest

    r = pl.program_id(1)
    cin = x_ref.shape[1]
    wout = x_ref.shape[2]
    cout2 = w_ref.shape[1]          # 2 * Cout (top/bottom output row of the pair)
    cout = cout2 // 2

    # Hoisted loop invariants (JAX does not CSE broadcast_in_dim).
    col = lax.broadcasted_iota(jnp.int32, (cin, wout), 1)
    first_col = col == 0
    last_col = col == wout - 1
    w_all = w_ref[...]                                           # (3, 2*Cout, 3*Cin) f32
    bias = jnp.broadcast_to(b_ref[...], (cout2, wout))           # (2*Cout, Wout)
    if project:
        wf = wf_ref[...]                                         # (Cf, Cout) f32
        bias_f = jnp.broadcast_to(bf_ref[...], (wf.shape[0], wout))

    def make_s(row):
        # row: (Cin, Wout) f32 -> (3*Cin, Wout) with [dx=-1 | dx=0 | dx=+1] blocks.
        right = jnp.where(first_col, 0.0, pltpu.roll(row, 1, axis=1))
        left = jnp.where(last_col, 0.0, pltpu.roll(row, wout - 1, axis=1))
        return jnp.concatenate([right, row, left], axis=0)

    def body(i, carry):
        base = r * th + i                      # global low-res row (pair) index
        acc = bias                             # (2*Cout, Wout), bias pre-added
        for k in range(3):                     # x_pad rows i, i+1, i+2
            row = x_ref[base + k].astype(jnp.float32)
            acc = acc + jnp.dot(w_all[k], make_s(row),
                                preferred_element_type=jnp.float32)
        acc = jnp.maximum(acc, 0.0)            # ReLU (before the 1x1 projection)
        top = acc[:cout]                       # output row 2*base
        bot = acc[cout:]                       # output row 2*base + 1
        if project:
            top = jnp.dot(wf, top, preferred_element_type=jnp.float32) + bias_f
            bot = jnp.dot(wf, bot, preferred_element_type=jnp.float32) + bias_f
        o_ref[2 * i] = top.astype(o_ref.dtype)
        o_ref[2 * i + 1] = bot.astype(o_ref.dtype)
        return carry

    lax.fori_loop(0, th, body, None)


def combine_up2_weights(w):
    """Fold the 2x nearest H-upsample + 3x3 taps into (3, 2*Cout, 3*Cin) weights.

    w: (Cout, Cin, 3, 3) PyTorch conv weight (ky, kx).
    Slice k of the result multiplies the k-th of the 3 loaded padded input rows
    (x_pad[i], x_pad[i+1], x_pad[i+2]); rows 0..Cout-1 produce output row 2i,
    rows Cout..2*Cout-1 produce output row 2i+1.  Columns are laid out as
    [dx=-1 | dx=0 | dx=+1] blocks of Cin, matching make_s() in the kernel.
    """
    cout, cin = w.shape[0], w.shape[1]

    def taps(ky_list):
        s = sum(w[:, :, ky, :] for ky in ky_list)          # (Cout, Cin, 3)
        return jnp.transpose(s, (0, 2, 1)).reshape(cout, 3 * cin)

    zeros = jnp.zeros((cout, 3 * cin), w.dtype)
    top = [taps([0]), taps([1, 2]), zeros]   # out row 2i   <- x[i-1], x[i]
    bot = [zeros, taps([0, 1]), taps([2])]   # out row 2i+1 <- x[i],   x[i+1]
    return jnp.stack(
        [jnp.concatenate([t, b_], axis=0) for t, b_ in zip(top, bot)], axis=0)


def _upsample_w_pad_h(x):
    # x: (N, H, C, W) bf16 -> (N, H+2, C, 2W) bf16.  Single XLA pass:
    # broadcast+reshape for the W-upsample, zero pad 1 row top/bottom for the
    # conv halo (the H-upsample itself is fused into the kernel weights).
    n, h, c, w = x.shape
    xu = jnp.broadcast_to(x[..., None], (n, h, c, w, 2)).reshape(n, h, c, 2 * w)
    return jnp.pad(xu, ((0, 0), (1, 1), (0, 0), (0, 0)))


_VMEM_LIMIT = 32 * 1024 * 1024   # safe on v5e (128 MiB), v6e (128 MiB), v7x (64 MiB)


def up2_conv3x3_relu(xu, w_c, b2, *, th=128):
    # xu: (N, Hin+2, Cin, Wout) bf16; w_c: (3, 2*Cout, 3*Cin); b2: (2*Cout, 1)
    n, hp, cin, wout = xu.shape
    hin = hp - 2
    cout2 = w_c.shape[1]
    cout = cout2 // 2
    th = min(th, hin)
    assert hin % th == 0, f"row tile {th} must divide Hin={hin}"
    return pl.pallas_call(
        functools.partial(_up2_conv3x3_kernel, th=th, project=False),
        out_shape=jax.ShapeDtypeStruct((n, 2 * hin, cout, wout), jnp.bfloat16),
        grid=(n, hin // th),
        in_specs=[
            pl.BlockSpec((None, hp, cin, wout), lambda i, r: (i, 0, 0, 0)),
            pl.BlockSpec((3, cout2, 3 * cin), lambda i, r: (0, 0, 0)),
            pl.BlockSpec((cout2, 1), lambda i, r: (0, 0)),
        ],
        out_specs=pl.BlockSpec((None, 2 * th, cout, wout),
                               lambda i, r: (i, r, 0, 0)),
        compiler_params=pltpu.CompilerParams(
            dimension_semantics=("parallel", "arbitrary"),
            vmem_limit_bytes=_VMEM_LIMIT),
    )(xu, w_c, b2)


def up2_conv3x3_relu_proj(xu, w_c, b2, wf, bf, *, th=128):
    # Last decoder stage with the fused 1x1 projection epilogue.
    # wf: (Cf, Cout) f32, bf: (Cf, 1) f32.  Output is NHCW f32.
    n, hp, cin, wout = xu.shape
    hin = hp - 2
    cout2 = w_c.shape[1]
    cout = cout2 // 2
    cf = wf.shape[0]
    th = min(th, hin)
    assert hin % th == 0, f"row tile {th} must divide Hin={hin}"
    return pl.pallas_call(
        functools.partial(_up2_conv3x3_kernel, th=th, project=True),
        out_shape=jax.ShapeDtypeStruct((n, 2 * hin, cf, wout), jnp.float32),
        grid=(n, hin // th),
        in_specs=[
            pl.BlockSpec((None, hp, cin, wout), lambda i, r: (i, 0, 0, 0)),
            pl.BlockSpec((3, cout2, 3 * cin), lambda i, r: (0, 0, 0)),
            pl.BlockSpec((cout2, 1), lambda i, r: (0, 0)),
            pl.BlockSpec((cf, cout), lambda i, r: (0, 0)),
            pl.BlockSpec((cf, 1), lambda i, r: (0, 0)),
        ],
        out_specs=pl.BlockSpec((None, 2 * th, cf, wout),
                               lambda i, r: (i, r, 0, 0)),
        compiler_params=pltpu.CompilerParams(
            dimension_semantics=("parallel", "arbitrary"),
            vmem_limit_bytes=_VMEM_LIMIT),
    )(xu, w_c, b2, wf, bf)


# ---------------------------------------------------------------------------
# Parameters (deterministic synthetic init; shapes follow the PyTorch module)
# ---------------------------------------------------------------------------
def init_params(key, backbone_channels, out_channels):
    ks = jax.random.split(key, 12)
    params = {
        "head1_w": jax.random.normal(ks[0], (1024, backbone_channels), jnp.float32) * 0.02,
        "head1_b": jax.random.normal(ks[1], (1024,), jnp.float32) * 0.02,
    }
    convs = []
    cin = 1
    for i in range(4):
        w = jax.random.normal(ks[2 + 2 * i], (8, cin, 3, 3), jnp.float32) * 0.1
        b = jax.random.normal(ks[3 + 2 * i], (8,), jnp.float32) * 0.1
        convs.append((w, b))
        cin = 8
    params["convs"] = convs
    params["final_w"] = jax.random.normal(ks[10], (out_channels, 8, 1, 1), jnp.float32) * 0.1
    params["final_b"] = jax.random.normal(ks[11], (out_channels,), jnp.float32) * 0.1
    return params


# ---------------------------------------------------------------------------
# Forward pass (head semantics: linear -> 4 x [up2 + conv3x3 + relu] -> conv1x1)
# ---------------------------------------------------------------------------
def vitb16_head_forward(params, x):
    bc = x.shape[-1]
    feats = x.reshape(-1, bc)
    out = linear(feats, params["head1_w"].T, params["head1_b"])      # (B, 1024)
    n = out.shape[0]
    # reshape(-1, 1, 32, 32) in NCHW, then to NHCW layout (N, H, C, W)
    out = out.reshape(n, 1, 32, 32).transpose(0, 2, 1, 3)            # (N, 32, 1, 32)
    # pad the single input channel to 8 so every stage sees the same Cin=8
    out = jnp.pad(out, ((0, 0), (0, 0), (0, 7), (0, 0)))
    out = out.astype(jnp.bfloat16)                                   # bf16 activations

    n_layers = len(params["convs"])
    for i, (w, b) in enumerate(params["convs"]):
        if i == 0:
            w = jnp.pad(w, ((0, 0), (0, 7), (0, 0), (0, 0)))         # Cin 1 -> 8 (no-op)
        w_c = combine_up2_weights(w)                                 # (3, 16, 24)
        b2 = jnp.concatenate([b, b]).reshape(-1, 1)                  # (16, 1)
        xu = _upsample_w_pad_h(out)                                  # (N, Hin+2, 8, 2W) bf16
        if i == n_layers - 1:
            wf = params["final_w"][:, :, 0, 0]                       # (Cf, 8)
            bf = params["final_b"].reshape(-1, 1)                    # (Cf, 1)
            out = up2_conv3x3_relu_proj(xu, w_c, b2, wf, bf)         # NHCW f32
        else:
            out = up2_conv3x3_relu(xu, w_c, b2)                      # NHCW bf16

    # back to PyTorch NCHW: (N, out_channels, 512, 512)
    return out.transpose(0, 2, 1, 3)


# ---------------------------------------------------------------------------
# Pure-JAX reference (for a self-check of the fused kernels)
# ---------------------------------------------------------------------------
def reference_forward(params, x):
    bc = x.shape[-1]
    out = x.reshape(-1, bc) @ params["head1_w"].T + params["head1_b"]
    n = out.shape[0]
    out = out.reshape(n, 1, 32, 32)
    for w, b in params["convs"]:
        out = jnp.repeat(jnp.repeat(out, 2, axis=2), 2, axis=3)
        out = lax.conv_general_dilated(
            out, w, (1, 1), ((1, 1), (1, 1)),
            dimension_numbers=("NCHW", "OIHW", "NCHW"),
            precision=lax.Precision.HIGHEST)
        out = jax.nn.relu(out + b[None, :, None, None])
    out = lax.conv_general_dilated(
        out, params["final_w"], (1, 1), ((0, 0), (0, 0)),
        dimension_numbers=("NCHW", "OIHW", "NCHW"),
        precision=lax.Precision.HIGHEST)
    return out + params["final_b"][None, :, None, None]


if __name__ == "__main__":
    backbone_channels = 32
    out_channels = 2

    key = jax.random.PRNGKey(0)
    pkey, xkey = jax.random.split(key)
    params = init_params(pkey, backbone_channels, out_channels)
    x = jax.random.normal(xkey, (2, backbone_channels), jnp.float32)

    fwd = jax.jit(vitb16_head_forward)
    out = jax.block_until_ready(fwd(params, x))

    assert out.shape == (2, out_channels, 512, 512), out.shape
    assert bool(jnp.all(jnp.isfinite(out)))

    # Self-check against a pure-JAX f32 reference (bf16 activation storage in the
    # Pallas path gives small deviations; tolerance is set well above that).
    ref = jax.block_until_ready(jax.jit(reference_forward)(params, x))
    err = float(jnp.max(jnp.abs(out - ref)))
    scale = float(jnp.max(jnp.abs(ref)))
    assert err <= 0.05 * scale + 1e-3, (err, scale)

    print("KERNEL_OK")
</pallas_src>

<mosaic_0001>
module attributes {stable_mosaic.version = 11 : i64} {
  func.func @_linear_kernel(%arg0: memref<2x32xf32, #tpu.memory_space<vmem>>, %arg1: memref<32x1024xf32, #tpu.memory_space<vmem>>, %arg2: memref<1x1024xf32, #tpu.memory_space<vmem>>, %arg3: memref<2x1024xf32, #tpu.memory_space<vmem>>) attributes {dimension_semantics = [], scalar_prefetch = 0 : i64, scratch_operands = 0 : i64, tpu.core_type = #tpu.core_type<tc>} {
    %c0 = arith.constant 0 : index
    %c0_0 = arith.constant 0 : index
    %0 = vector.load %arg0[%c0, %c0_0] : memref<2x32xf32, #tpu.memory_space<vmem>>, vector<2x32xf32>
    %c0_1 = arith.constant 0 : index
    %c0_2 = arith.constant 0 : index
    %1 = vector.load %arg1[%c0_1, %c0_2] : memref<32x1024xf32, #tpu.memory_space<vmem>>, vector<32x1024xf32>
    %cst = arith.constant dense<0.000000e+00> : vector<2x1024xf32>
    %2 = tpu.matmul %0, %1, %cst {dimension_numbers = #tpu.dot_dimension_numbers<[1], [0], [0], [1], [0, 0, 1, 1], [], []>} : vector<2x32xf32>, vector<32x1024xf32>, vector<2x1024xf32> -> vector<2x1024xf32>
    %c0_3 = arith.constant 0 : index
    %c0_4 = arith.constant 0 : index
    %3 = vector.load %arg2[%c0_3, %c0_4] : memref<1x1024xf32, #tpu.memory_space<vmem>>, vector<1x1024xf32>
    %4 = vector.broadcast %3 : vector<1x1024xf32> to vector<2x1024xf32>
    %5 = arith.addf %2, %4 : vector<2x1024xf32>
    %c0_5 = arith.constant 0 : index
    %c0_6 = arith.constant 0 : index
    %6 = vector.load %arg3[%c0_5, %c0_6] : memref<2x1024xf32, #tpu.memory_space<vmem>>, vector<2x1024xf32>
    tpu.vector_store %arg3[%c0_5, %c0_6], %5 {strides = array<i32>} : memref<2x1024xf32, #tpu.memory_space<vmem>>, vector<2x1024xf32>,
    return
  }
}

module attributes {stable_mosaic.version = 11 : i64} {
  func.func @_up2_conv3x3_kernel(%arg0: i32, %arg1: i32, %arg2: memref<1x34x8x64xbf16, #tpu.memory_space<vmem>>, %arg3: memref<3x16x24xf32, #tpu.memory_space<vmem>>, %arg4: memref<16x1xf32, #tpu.memory_space<vmem>>, %arg5: memref<1x64x8x64xbf16, #tpu.memory_space<vmem>>) attributes {dimension_semantics = [#tpu.dimension_semantics<parallel>, #tpu.dimension_semantics<arbitrary>], iteration_bounds = array<i64: 2, 1>, scalar_prefetch = 0 : i64, scratch_operands = 0 : i64, tpu.core_type = #tpu.core_type<tc>, window_params = [{transform_indices = @transform_0, window_bounds = array<i64: 1, 34, 8, 64>}, {pipeline_mode = #tpu.pipeline_mode<synchronous>, transform_indices = @transform_1, window_bounds = array<i64: 3, 16, 24>}, {pipeline_mode = #tpu.pipeline_mode<synchronous>, transform_indices = @transform_2, window_bounds = array<i64: 16, 1>}, {transform_indices = @transform_3, window_bounds = array<i64: 1, 64, 8, 64>}]} {
    %0 = tpu.iota {dimensions = array<i32: 1>} : vector<8x64xi32>
    %c0_i32 = arith.constant 0 : i32
    %1 = vector.broadcast %c0_i32 : i32 to vector<8x64xi32>
    %2 = arith.cmpi eq, %0, %1 : vector<8x64xi32>
    %c63_i32 = arith.constant 63 : i32
    %3 = vector.broadcast %c63_i32 : i32 to vector<8x64xi32>
    %4 = arith.cmpi eq, %0, %3 : vector<8x64xi32>
    %c0 = arith.constant 0 : index
    %c0_0 = arith.constant 0 : index
    %c0_1 = arith.constant 0 : index
    %5 = vector.load %arg3[%c0, %c0_0, %c0_1] : memref<3x16x24xf32, #tpu.memory_space<vmem>>, vector<3x16x24xf32>
    %c0_2 = arith.constant 0 : index
    %c0_3 = arith.constant 0 : index
    %6 = vector.load %arg4[%c0_2, %c0_3] : memref<16x1xf32, #tpu.memory_space<vmem>>, vector<16x1xf32>
    %7 = vector.shape_cast %6 : vector<16x1xf32> to vector<16x1xf32>
    %8 = vector.broadcast %7 : vector<16x1xf32> to vector<16x64xf32>
    %c0_i32_4 = arith.constant 0 : i32
    %c32_i32 = arith.constant 32 : i32
    %9 = arith.addi %c0_i32_4, %c32_i32 : i32
    %c1_i32 = arith.constant 1 : i32
    scf.for %arg6 = %c0_i32_4 to %9 step %c1_i32  : i32 {
      %c32_i32_6 = arith.constant 32 : i32
      %10 = arith.muli %arg1, %c32_i32_6 : i32
      %11 = arith.addi %10, %arg6 : i32
      %c0_i32_7 = arith.constant 0 : i32
      %12 = arith.addi %11, %c0_i32_7 : i32
      %c0_8 = arith.constant 0 : index
      %13 = arith.index_cast %12 : i32 to index
      %c0_9 = arith.constant 0 : index
      %c0_10 = arith.constant 0 : index
      %14 = vector.load %arg2[%c0_8, %13, %c0_9, %c0_10] : memref<1x34x8x64xbf16, #tpu.memory_space<vmem>>, vector<1x1x8x64xbf16>
      %15 = vector.shape_cast %14 : vector<1x1x8x64xbf16> to vector<8x64xbf16>
      %16 = arith.extf %15 : vector<8x64xbf16> to vector<8x64xf32>
      %17 = vector.extract_strided_slice %5 {offsets = [0, 0, 0], sizes = [1, 16, 24], strides = [1, 1, 1]} : vector<3x16x24xf32> to vector<1x16x24xf32>
      %18 = vector.shape_cast %17 : vector<1x16x24xf32> to vector<16x24xf32>
      %c1_i32_11 = arith.constant 1 : i32
      %19 = tpu.dynamic_rotate %16 by %c1_i32_11 dim 1 : vector<8x64xf32>, i32 -> vector<8x64xf32>
      %cst = arith.constant 0.000000e+00 : f32
      %20 = vector.broadcast %cst : f32 to vector<8x64xf32>
      %21 = arith.select %2, %20, %19 : vector<8x64xi1>, vector<8x64xf32>
      %c63_i32_12 = arith.constant 63 : i32
      %22 = tpu.dynamic_rotate %16 by %c63_i32_12 dim 1 : vector<8x64xf32>, i32 -> vector<8x64xf32>
      %cst_13 = arith.constant 0.000000e+00 : f32
      %23 = vector.broadcast %cst_13 : f32 to vector<8x64xf32>
      %24 = arith.select %4, %23, %22 : vector<8x64xi1>, vector<8x64xf32>
      %25 = tpu.concatenate %21, %16, %24 in 0 : vector<8x64xf32>, vector<8x64xf32>, vector<8x64xf32> -> vector<24x64xf32>
      %cst_14 = arith.constant dense<0.000000e+00> : vector<16x64xf32>
      %26 = tpu.matmul %18, %25, %cst_14 {dimension_numbers = #tpu.dot_dimension_numbers<[1], [0], [0], [1], [0, 0, 1, 1], [], []>} : vector<16x24xf32>, vector<24x64xf32>, vector<16x64xf32> -> vector<16x64xf32>
      %27 = arith.addf %8, %26 : vector<16x64xf32>
      %c1_i32_15 = arith.constant 1 : i32
      %28 = arith.addi %11, %c1_i32_15 : i32
      %c0_16 = arith.constant 0 : index
      %29 = arith.index_cast %28 : i32 to index
      %c0_17 = arith.constant 0 : index
      %c0_18 = arith.constant 0 : index
      %30 = vector.load %arg2[%c0_16, %29, %c0_17, %c0_18] : memref<1x34x8x64xbf16, #tpu.memory_space<vmem>>, vector<1x1x8x64xbf16>
      %31 = vector.shape_cast %30 : vector<1x1x8x64xbf16> to vector<8x64xbf16>
      %32 = arith.extf %31 : vector<8x64xbf16> to vector<8x64xf32>
      %33 = vector.extract_strided_slice %5 {offsets = [1, 0, 0], sizes = [1, 16, 24], strides = [1, 1, 1]} : vector<3x16x24xf32> to vector<1x16x24xf32>
      %34 = vector.shape_cast %33 : vector<1x16x24xf32> to vector<16x24xf32>
      %c1_i32_19 = arith.constant 1 : i32
      %35 = tpu.dynamic_rotate %32 by %c1_i32_19 dim 1 : vector<8x64xf32>, i32 -> vector<8x64xf32>
      %cst_20 = arith.constant 0.000000e+00 : f32
      %36 = vector.broadcast %cst_20 : f32 to vector<8x64xf32>
      %37 = arith.select %2, %36, %35 : vector<8x64xi1>, vector<8x64xf32>
      %c63_i32_21 = arith.constant 63 : i32
      %38 = tpu.dynamic_rotate %32 by %c63_i32_21 dim 1 : vector<8x64xf32>, i32 -> vector<8x64xf32>
      %cst_22 = arith.constant 0.000000e+00 : f32
      %39 = vector.broadcast %cst_22 : f32 to vector<8x64xf32>
      %40 = arith.select %4, %39, %38 : vector<8x64xi1>, vector<8x64xf32>
      %41 = tpu.concatenate %37, %32, %40 in 0 : vector<8x64xf32>, vector<8x64xf32>, vector<8x64xf32> -> vector<24x64xf32>
      %cst_23 = arith.constant dense<0.000000e+00> : vector<16x64xf32>
      %42 = tpu.matmul %34, %41, %cst_23 {dimension_numbers = #tpu.dot_dimension_numbers<[1], [0], [0], [1], [0, 0, 1, 1], [], []>} : vector<16x24xf32>, vector<24x64xf32>, vector<16x64xf32> -> vector<16x64xf32>
      %43 = arith.addf %27, %42 : vector<16x64xf32>
      %c2_i32 = arith.constant 2 : i32
      %44 = arith.addi %11, %c2_i32 : i32
      %c0_24 = arith.constant 0 : index
      %45 = arith.index_cast %44 : i32 to index
      %c0_25 = arith.constant 0 : index
      %c0_26 = arith.constant 0 : index
      %46 = vector.load %arg2[%c0_24, %45, %c0_25, %c0_26] : memref<1x34x8x64xbf16, #tpu.memory_space<vmem>>, vector<1x1x8x64xbf16>
      %47 = vector.shape_cast %46 : vector<1x1x8x64xbf16> to vector<8x64xbf16>
      %48 = arith.extf %47 : vector<8x64xbf16> to vector<8x64xf32>
      %49 = vector.extract_strided_slice %5 {offsets = [2, 0, 0], sizes = [1, 16, 24], strides = [1, 1, 1]} : vector<3x16x24xf32> to vector<1x16x24xf32>
      %50 = vector.shape_cast %49 : vector<1x16x24xf32> to vector<16x24xf32>
      %c1_i32_27 = arith.constant 1 : i32
      %51 = tpu.dynamic_rotate %48 by %c1_i32_27 dim 1 : vector<8x64xf32>, i32 -> vector<8x64xf32>
      %cst_28 = arith.constant 0.000000e+00 : f32
      %52 = vector.broadcast %cst_28 : f32 to vector<8x64xf32>
      %53 = arith.select %2, %52, %51 : vector<8x64xi1>, vector<8x64xf32>
      %c63_i32_29 = arith.constant 63 : i32
      %54 = tpu.dynamic_rotate %48 by %c63_i32_29 dim 1 : vector<8x64xf32>, i32 -> vector<8x64xf32>
      %cst_30 = arith.constant 0.000000e+00 : f32
      %55 = vector.broadcast %cst_30 : f32 to vector<8x64xf32>
      %56 = arith.select %4, %55, %54 : vector<8x64xi1>, vector<8x64xf32>
      %57 = tpu.concatenate %53, %48, %56 in 0 : vector<8x64xf32>, vector<8x64xf32>, vector<8x64xf32> -> vector<24x64xf32>
      %cst_31 = arith.constant dense<0.000000e+00> : vector<16x64xf32>
      %58 = tpu.matmul %50, %57, %cst_31 {dimension_numbers = #tpu.dot_dimension_numbers<[1], [0], [0], [1], [0, 0, 1, 1], [], []>} : vector<16x24xf32>, vector<24x64xf32>, vector<16x64xf32> -> vector<16x64xf32>
      %59 = arith.addf %43, %58 : vector<16x64xf32>
      %cst_32 = arith.constant 0.000000e+00 : f32
      %60 = vector.broadcast %cst_32 : f32 to vector<16x64xf32>
      %61 = arith.maximumf %59, %60 : vector<16x64xf32>
      %62 = vector.extract_strided_slice %61 {offsets = [0, 0], sizes = [8, 64], strides = [1, 1]} : vector<16x64xf32> to vector<8x64xf32>
      %63 = vector.extract_strided_slice %61 {offsets = [8, 0], sizes = [8, 64], strides = [1, 1]} : vector<16x64xf32> to vector<8x64xf32>
      %64 = arith.truncf %62 : vector<8x64xf32> to vector<8x64xbf16>
      %c2_i32_33 = arith.constant 2 : i32
      %65 = arith.muli %c2_i32_33, %arg6 : i32
      %c0_34 = arith.constant 0 : index
      %66 = arith.index_cast %65 : i32 to index
      %c0_35 = arith.constant 0 : index
      %c0_36 = arith.constant 0 : index
      %67 = vector.load %arg5[%c0_34, %66, %c0_35, %c0_36] : memref<1x64x8x64xbf16, #tpu.memory_space<vmem>>, vector<1x1x8x64xbf16>
      %68 = vector.shape_cast %67 : vector<1x1x8x64xbf16> to vector<8x64xbf16>
      %69 = vector.shape_cast %64 : vector<8x64xbf16> to vector<1x1x8x64xbf16>
      tpu.vector_store %arg5[%c0_34, %66, %c0_35, %c0_36], %69 {strides = array<i32>} : memref<1x64x8x64xbf16, #tpu.memory_space<vmem>>, vector<1x1x8x64xbf16>,
      %70 = arith.truncf %63 : vector<8x64xf32> to vector<8x64xbf16>
      %c2_i32_37 = arith.constant 2 : i32
      %71 = arith.muli %c2_i32_37, %arg6 : i32
      %c1_i32_38 = arith.constant 1 : i32
      %72 = arith.addi %71, %c1_i32_38 : i32
      %c0_39 = arith.constant 0 : index
      %73 = arith.index_cast %72 : i32 to index
      %c0_40 = arith.constant 0 : index
      %c0_41 = arith.constant 0 : index
      %74 = vector.load %arg5[%c0_39, %73, %c0_40, %c0_41] : memref<1x64x8x64xbf16, #tpu.memory_space<vmem>>, vector<1x1x8x64xbf16>
      %75 = vector.shape_cast %74 : vector<1x1x8x64xbf16> to vector<8x64xbf16>
      %76 = vector.shape_cast %70 : vector<8x64xbf16> to vector<1x1x8x64xbf16>
      tpu.vector_store %arg5[%c0_39, %73, %c0_40, %c0_41], %76 {strides = array<i32>} : memref<1x64x8x64xbf16, #tpu.memory_space<vmem>>, vector<1x1x8x64xbf16>,
    }
    %c32_i32_5 = arith.constant 32 : i32
    return
  }
  func.func @transform_0(%arg0: i32, %arg1: i32) -> (i32, i32, i32, i32) {
    %c0_i32 = arith.constant 0 : i32
    %c0_i32_0 = arith.constant 0 : i32
    %c0_i32_1 = arith.constant 0 : i32
    %c0_i32_2 = arith.constant 0 : i32
    return %arg0, %c0_i32, %c0_i32_0, %c0_i32_1 : i32, i32, i32, i32
  }
  func.func @transform_1(%arg0: i32, %arg1: i32) -> (i32, i32, i32) {
    %c0_i32 = arith.constant 0 : i32
    %c0_i32_0 = arith.constant 0 : i32
    %c0_i32_1 = arith.constant 0 : i32
    %c0_i32_2 = arith.constant 0 : i32
    return %c0_i32, %c0_i32_0, %c0_i32_1 : i32, i32, i32
  }
  func.func @transform_2(%arg0: i32, %arg1: i32) -> (i32, i32) {
    %c0_i32 = arith.constant 0 : i32
    %c0_i32_0 = arith.constant 0 : i32
    %c0_i32_1 = arith.constant 0 : i32
    return %c0_i32, %c0_i32_0 : i32, i32
  }
  func.func @transform_3(%arg0: i32, %arg1: i32) -> (i32, i32, i32, i32) {
    %c0_i32 = arith.constant 0 : i32
    %c0_i32_0 = arith.constant 0 : i32
    %c0_i32_1 = arith.constant 0 : i32
    return %arg0, %arg1, %c0_i32, %c0_i32_0 : i32, i32, i32, i32
  }
}

module attributes {stable_mosaic.version = 11 : i64} {
  func.func @_up2_conv3x3_kernel(%arg0: i32, %arg1: i32, %arg2: memref<1x66x8x128xbf16, #tpu.memory_space<vmem>>, %arg3: memref<3x16x24xf32, #tpu.memory_space<vmem>>, %arg4: memref<16x1xf32, #tpu.memory_space<vmem>>, %arg5: memref<1x128x8x128xbf16, #tpu.memory_space<vmem>>) attributes {dimension_semantics = [#tpu.dimension_semantics<parallel>, #tpu.dimension_semantics<arbitrary>], iteration_bounds = array<i64: 2, 1>, scalar_prefetch = 0 : i64, scratch_operands = 0 : i64, tpu.core_type = #tpu.core_type<tc>, window_params = [{transform_indices = @transform_0, window_bounds = array<i64: 1, 66, 8, 128>}, {pipeline_mode = #tpu.pipeline_mode<synchronous>, transform_indices = @transform_1, window_bounds = array<i64: 3, 16, 24>}, {pipeline_mode = #tpu.pipeline_mode<synchronous>, transform_indices = @transform_2, window_bounds = array<i64: 16, 1>}, {transform_indices = @transform_3, window_bounds = array<i64: 1, 128, 8, 128>}]} {
    %0 = tpu.iota {dimensions = array<i32: 1>} : vector<8x128xi32>
    %c0_i32 = arith.constant 0 : i32
    %1 = vector.broadcast %c0_i32 : i32 to vector<8x128xi32>
    %2 = arith.cmpi eq, %0, %1 : vector<8x128xi32>
    %c127_i32 = arith.constant 127 : i32
    %3 = vector.broadcast %c127_i32 : i32 to vector<8x128xi32>
    %4 = arith.cmpi eq, %0, %3 : vector<8x128xi32>
    %c0 = arith.constant 0 : index
    %c0_0 = arith.constant 0 : index
    %c0_1 = arith.constant 0 : index
    %5 = vector.load %arg3[%c0, %c0_0, %c0_1] : memref<3x16x24xf32, #tpu.memory_space<vmem>>, vector<3x16x24xf32>
    %c0_2 = arith.constant 0 : index
    %c0_3 = arith.constant 0 : index
    %6 = vector.load %arg4[%c0_2, %c0_3] : memref<16x1xf32, #tpu.memory_space<vmem>>, vector<16x1xf32>
    %7 = vector.shape_cast %6 : vector<16x1xf32> to vector<16x1xf32>
    %8 = vector.broadcast %7 : vector<16x1xf32> to vector<16x128xf32>
    %c0_i32_4 = arith.constant 0 : i32
    %c64_i32 = arith.constant 64 : i32
    %9 = arith.addi %c0_i32_4, %c64_i32 : i32
    %c1_i32 = arith.constant 1 : i32
    scf.for %arg6 = %c0_i32_4 to %9 step %c1_i32  : i32 {
      %c64_i32_6 = arith.constant 64 : i32
      %10 = arith.muli %arg1, %c64_i32_6 : i32
      %11 = arith.addi %10, %arg6 : i32
      %c0_i32_7 = arith.constant 0 : i32
      %12 = arith.addi %11, %c0_i32_7 : i32
      %c0_8 = arith.constant 0 : index
      %13 = arith.index_cast %12 : i32 to index
      %c0_9 = arith.constant 0 : index
      %c0_10 = arith.constant 0 : index
      %14 = vector.load %arg2[%c0_8, %13, %c0_9, %c0_10] : memref<1x66x8x128xbf16, #tpu.memory_space<vmem>>, vector<1x1x8x128xbf16>
      %15 = vector.shape_cast %14 : vector<1x1x8x128xbf16> to vector<8x128xbf16>
      %16 = arith.extf %15 : vector<8x128xbf16> to vector<8x128xf32>
      %17 = vector.extract_strided_slice %5 {offsets = [0, 0, 0], sizes = [1, 16, 24], strides = [1, 1, 1]} : vector<3x16x24xf32> to vector<1x16x24xf32>
      %18 = vector.shape_cast %17 : vector<1x16x24xf32> to vector<16x24xf32>
      %c1_i32_11 = arith.constant 1 : i32
      %19 = tpu.dynamic_rotate %16 by %c1_i32_11 dim 1 : vector<8x128xf32>, i32 -> vector<8x128xf32>
      %cst = arith.constant 0.000000e+00 : f32
      %20 = vector.broadcast %cst : f32 to vector<8x128xf32>
      %21 = arith.select %2, %20, %19 : vector<8x128xi1>, vector<8x128xf32>
      %c127_i32_12 = arith.constant 127 : i32
      %22 = tpu.dynamic_rotate %16 by %c127_i32_12 dim 1 : vector<8x128xf32>, i32 -> vector<8x128xf32>
      %cst_13 = arith.constant 0.000000e+00 : f32
      %23 = vector.broadcast %cst_13 : f32 to vector<8x128xf32>
      %24 = arith.select %4, %23, %22 : vector<8x128xi1>, vector<8x128xf32>
      %25 = tpu.concatenate %21, %16, %24 in 0 : vector<8x128xf32>, vector<8x128xf32>, vector<8x128xf32> -> vector<24x128xf32>
      %cst_14 = arith.constant dense<0.000000e+00> : vector<16x128xf32>
      %26 = tpu.matmul %18, %25, %cst_14 {dimension_numbers = #tpu.dot_dimension_numbers<[1], [0], [0], [1], [0, 0, 1, 1], [], []>} : vector<16x24xf32>, vector<24x128xf32>, vector<16x128xf32> -> vector<16x128xf32>
      %27 = arith.addf %8, %26 : vector<16x128xf32>
      %c1_i32_15 = arith.constant 1 : i32
      %28 = arith.addi %11, %c1_i32_15 : i32
      %c0_16 = arith.constant 0 : index
      %29 = arith.index_cast %28 : i32 to index
      %c0_17 = arith.constant 0 : index
      %c0_18 = arith.constant 0 : index
      %30 = vector.load %arg2[%c0_16, %29, %c0_17, %c0_18] : memref<1x66x8x128xbf16, #tpu.memory_space<vmem>>, vector<1x1x8x128xbf16>
      %31 = vector.shape_cast %30 : vector<1x1x8x128xbf16> to vector<8x128xbf16>
      %32 = arith.extf %31 : vector<8x128xbf16> to vector<8x128xf32>
      %33 = vector.extract_strided_slice %5 {offsets = [1, 0, 0], sizes = [1, 16, 24], strides = [1, 1, 1]} : vector<3x16x24xf32> to vector<1x16x24xf32>
      %34 = vector.shape_cast %33 : vector<1x16x24xf32> to vector<16x24xf32>
      %c1_i32_19 = arith.constant 1 : i32
      %35 = tpu.dynamic_rotate %32 by %c1_i32_19 dim 1 : vector<8x128xf32>, i32 -> vector<8x128xf32>
      %cst_20 = arith.constant 0.000000e+00 : f32
      %36 = vector.broadcast %cst_20 : f32 to vector<8x128xf32>
      %37 = arith.select %2, %36, %35 : vector<8x128xi1>, vector<8x128xf32>
      %c127_i32_21 = arith.constant 127 : i32
      %38 = tpu.dynamic_rotate %32 by %c127_i32_21 dim 1 : vector<8x128xf32>, i32 -> vector<8x128xf32>
      %cst_22 = arith.constant 0.000000e+00 : f32
      %39 = vector.broadcast %cst_22 : f32 to vector<8x128xf32>
      %40 = arith.select %4, %39, %38 : vector<8x128xi1>, vector<8x128xf32>
      %41 = tpu.concatenate %37, %32, %40 in 0 : vector<8x128xf32>, vector<8x128xf32>, vector<8x128xf32> -> vector<24x128xf32>
      %cst_23 = arith.constant dense<0.000000e+00> : vector<16x128xf32>
      %42 = tpu.matmul %34, %41, %cst_23 {dimension_numbers = #tpu.dot_dimension_numbers<[1], [0], [0], [1], [0, 0, 1, 1], [], []>} : vector<16x24xf32>, vector<24x128xf32>, vector<16x128xf32> -> vector<16x128xf32>
      %43 = arith.addf %27, %42 : vector<16x128xf32>
      %c2_i32 = arith.constant 2 : i32
      %44 = arith.addi %11, %c2_i32 : i32
      %c0_24 = arith.constant 0 : index
      %45 = arith.index_cast %44 : i32 to index
      %c0_25 = arith.constant 0 : index
      %c0_26 = arith.constant 0 : index
      %46 = vector.load %arg2[%c0_24, %45, %c0_25, %c0_26] : memref<1x66x8x128xbf16, #tpu.memory_space<vmem>>, vector<1x1x8x128xbf16>
      %47 = vector.shape_cast %46 : vector<1x1x8x128xbf16> to vector<8x128xbf16>
      %48 = arith.extf %47 : vector<8x128xbf16> to vector<8x128xf32>
      %49 = vector.extract_strided_slice %5 {offsets = [2, 0, 0], sizes = [1, 16, 24], strides = [1, 1, 1]} : vector<3x16x24xf32> to vector<1x16x24xf32>
      %50 = vector.shape_cast %49 : vector<1x16x24xf32> to vector<16x24xf32>
      %c1_i32_27 = arith.constant 1 : i32
      %51 = tpu.dynamic_rotate %48 by %c1_i32_27 dim 1 : vector<8x128xf32>, i32 -> vector<8x128xf32>
      %cst_28 = arith.constant 0.000000e+00 : f32
      %52 = vector.broadcast %cst_28 : f32 to vector<8x128xf32>
      %53 = arith.select %2, %52, %51 : vector<8x128xi1>, vector<8x128xf32>
      %c127_i32_29 = arith.constant 127 : i32
      %54 = tpu.dynamic_rotate %48 by %c127_i32_29 dim 1 : vector<8x128xf32>, i32 -> vector<8x128xf32>
      %cst_30 = arith.constant 0.000000e+00 : f32
      %55 = vector.broadcast %cst_30 : f32 to vector<8x128xf32>
      %56 = arith.select %4, %55, %54 : vector<8x128xi1>, vector<8x128xf32>
      %57 = tpu.concatenate %53, %48, %56 in 0 : vector<8x128xf32>, vector<8x128xf32>, vector<8x128xf32> -> vector<24x128xf32>
      %cst_31 = arith.constant dense<0.000000e+00> : vector<16x128xf32>
      %58 = tpu.matmul %50, %57, %cst_31 {dimension_numbers = #tpu.dot_dimension_numbers<[1], [0], [0], [1], [0, 0, 1, 1], [], []>} : vector<16x24xf32>, vector<24x128xf32>, vector<16x128xf32> -> vector<16x128xf32>
      %59 = arith.addf %43, %58 : vector<16x128xf32>
      %cst_32 = arith.constant 0.000000e+00 : f32
      %60 = vector.broadcast %cst_32 : f32 to vector<16x128xf32>
      %61 = arith.maximumf %59, %60 : vector<16x128xf32>
      %62 = vector.extract_strided_slice %61 {offsets = [0, 0], sizes = [8, 128], strides = [1, 1]} : vector<16x128xf32> to vector<8x128xf32>
      %63 = vector.extract_strided_slice %61 {offsets = [8, 0], sizes = [8, 128], strides = [1, 1]} : vector<16x128xf32> to vector<8x128xf32>
      %64 = arith.truncf %62 : vector<8x128xf32> to vector<8x128xbf16>
      %c2_i32_33 = arith.constant 2 : i32
      %65 = arith.muli %c2_i32_33, %arg6 : i32
      %c0_34 = arith.constant 0 : index
      %66 = arith.index_cast %65 : i32 to index
      %c0_35 = arith.constant 0 : index
      %c0_36 = arith.constant 0 : index
      %67 = vector.load %arg5[%c0_34, %66, %c0_35, %c0_36] : memref<1x128x8x128xbf16, #tpu.memory_space<vmem>>, vector<1x1x8x128xbf16>
      %68 = vector.shape_cast %67 : vector<1x1x8x128xbf16> to vector<8x128xbf16>
      %69 = vector.shape_cast %64 : vector<8x128xbf16> to vector<1x1x8x128xbf16>
      tpu.vector_store %arg5[%c0_34, %66, %c0_35, %c0_36], %69 {strides = array<i32>} : memref<1x128x8x128xbf16, #tpu.memory_space<vmem>>, vector<1x1x8x128xbf16>,
      %70 = arith.truncf %63 : vector<8x128xf32> to vector<8x128xbf16>
      %c2_i32_37 = arith.constant 2 : i32
      %71 = arith.muli %c2_i32_37, %arg6 : i32
      %c1_i32_38 = arith.constant 1 : i32
      %72 = arith.addi %71, %c1_i32_38 : i32
      %c0_39 = arith.constant 0 : index
      %73 = arith.index_cast %72 : i32 to index
      %c0_40 = arith.constant 0 : index
      %c0_41 = arith.constant 0 : index
      %74 = vector.load %arg5[%c0_39, %73, %c0_40, %c0_41] : memref<1x128x8x128xbf16, #tpu.memory_space<vmem>>, vector<1x1x8x128xbf16>
      %75 = vector.shape_cast %74 : vector<1x1x8x128xbf16> to vector<8x128xbf16>
      %76 = vector.shape_cast %70 : vector<8x128xbf16> to vector<1x1x8x128xbf16>
      tpu.vector_store %arg5[%c0_39, %73, %c0_40, %c0_41], %76 {strides = array<i32>} : memref<1x128x8x128xbf16, #tpu.memory_space<vmem>>, vector<1x1x8x128xbf16>,
    }
    %c64_i32_5 = arith.constant 64 : i32
    return
  }
  func.func @transform_0(%arg0: i32, %arg1: i32) -> (i32, i32, i32, i32) {
    %c0_i32 = arith.constant 0 : i32
    %c0_i32_0 = arith.constant 0 : i32
    %c0_i32_1 = arith.constant 0 : i32
    %c0_i32_2 = arith.constant 0 : i32
    return %arg0, %c0_i32, %c0_i32_0, %c0_i32_1 : i32, i32, i32, i32
  }
  func.func @transform_1(%arg0: i32, %arg1: i32) -> (i32, i32, i32) {
    %c0_i32 = arith.constant 0 : i32
    %c0_i32_0 = arith.constant 0 : i32
    %c0_i32_1 = arith.constant 0 : i32
    %c0_i32_2 = arith.constant 0 : i32
    return %c0_i32, %c0_i32_0, %c0_i32_1 : i32, i32, i32
  }
  func.func @transform_2(%arg0: i32, %arg1: i32) -> (i32, i32) {
    %c0_i32 = arith.constant 0 : i32
    %c0_i32_0 = arith.constant 0 : i32
    %c0_i32_1 = arith.constant 0 : i32
    return %c0_i32, %c0_i32_0 : i32, i32
  }
  func.func @transform_3(%arg0: i32, %arg1: i32) -> (i32, i32, i32, i32) {
    %c0_i32 = arith.constant 0 : i32
    %c0_i32_0 = arith.constant 0 : i32
    %c0_i32_1 = arith.constant 0 : i32
    return %arg0, %arg1, %c0_i32, %c0_i32_0 : i32, i32, i32, i32
  }
}

module attributes {stable_mosaic.version = 11 : i64} {
  func.func @_up2_conv3x3_kernel(%arg0: i32, %arg1: i32, %arg2: memref<1x130x8x256xbf16, #tpu.memory_space<vmem>>, %arg3: memref<3x16x24xf32, #tpu.memory_space<vmem>>, %arg4: memref<16x1xf32, #tpu.memory_space<vmem>>, %arg5: memref<1x256x8x256xbf16, #tpu.memory_space<vmem>>) attributes {dimension_semantics = [#tpu.dimension_semantics<parallel>, #tpu.dimension_semantics<arbitrary>], iteration_bounds = array<i64: 2, 1>, scalar_prefetch = 0 : i64, scratch_operands = 0 : i64, tpu.core_type = #tpu.core_type<tc>, window_params = [{transform_indices = @transform_0, window_bounds = array<i64: 1, 130, 8, 256>}, {pipeline_mode = #tpu.pipeline_mode<synchronous>, transform_indices = @transform_1, window_bounds = array<i64: 3, 16, 24>}, {pipeline_mode = #tpu.pipeline_mode<synchronous>, transform_indices = @transform_2, window_bounds = array<i64: 16, 1>}, {transform_indices = @transform_3, window_bounds = array<i64: 1, 256, 8, 256>}]} {
    %0 = tpu.iota {dimensions = array<i32: 1>} : vector<8x256xi32>
    %c0_i32 = arith.constant 0 : i32
    %1 = vector.broadcast %c0_i32 : i32 to vector<8x256xi32>
    %2 = arith.cmpi eq, %0, %1 : vector<8x256xi32>
    %c255_i32 = arith.constant 255 : i32
    %3 = vector.broadcast %c255_i32 : i32 to vector<8x256xi32>
    %4 = arith.cmpi eq, %0, %3 : vector<8x256xi32>
    %c0 = arith.constant 0 : index
    %c0_0 = arith.constant 0 : index
    %c0_1 = arith.constant 0 : index
    %5 = vector.load %arg3[%c0, %c0_0, %c0_1] : memref<3x16x24xf32, #tpu.memory_space<vmem>>, vector<3x16x24xf32>
    %c0_2 = arith.constant 0 : index
    %c0_3 = arith.constant 0 : index
    %6 = vector.load %arg4[%c0_2, %c0_3] : memref<16x1xf32, #tpu.memory_space<vmem>>, vector<16x1xf32>
    %7 = vector.shape_cast %6 : vector<16x1xf32> to vector<16x1xf32>
    %8 = vector.broadcast %7 : vector<16x1xf32> to vector<16x256xf32>
    %c0_i32_4 = arith.constant 0 : i32
    %c128_i32 = arith.constant 128 : i32
    %9 = arith.addi %c0_i32_4, %c128_i32 : i32
    %c1_i32 = arith.constant 1 : i32
    scf.for %arg6 = %c0_i32_4 to %9 step %c1_i32  : i32 {
      %c128_i32_6 = arith.constant 128 : i32
      %10 = arith.muli %arg1, %c128_i32_6 : i32
      %11 = arith.addi %10, %arg6 : i32
      %c0_i32_7 = arith.constant 0 : i32
      %12 = arith.addi %11, %c0_i32_7 : i32
      %c0_8 = arith.constant 0 : index
      %13 = arith.index_cast %12 : i32 to index
      %c0_9 = arith.constant 0 : index
      %c0_10 = arith.constant 0 : index
      %14 = vector.load %arg2[%c0_8, %13, %c0_9, %c0_10] : memref<1x130x8x256xbf16, #tpu.memory_space<vmem>>, vector<1x1x8x256xbf16>
      %15 = vector.shape_cast %14 : vector<1x1x8x256xbf16> to vector<8x256xbf16>
      %16 = arith.extf %15 : vector<8x256xbf16> to vector<8x256xf32>
      %17 = vector.extract_strided_slice %5 {offsets = [0, 0, 0], sizes = [1, 16, 24], strides = [1, 1, 1]} : vector<3x16x24xf32> to vector<1x16x24xf32>
      %18 = vector.shape_cast %17 : vector<1x16x24xf32> to vector<16x24xf32>
      %c1_i32_11 = arith.constant 1 : i32
      %19 = tpu.dynamic_rotate %16 by %c1_i32_11 dim 1 : vector<8x256xf32>, i32 -> vector<8x256xf32>
      %cst = arith.constant 0.000000e+00 : f32
      %20 = vector.broadcast %cst : f32 to vector<8x256xf32>
      %21 = arith.select %2, %20, %19 : vector<8x256xi1>, vector<8x256xf32>
      %c255_i32_12 = arith.constant 255 : i32
      %22 = tpu.dynamic_rotate %16 by %c255_i32_12 dim 1 : vector<8x256xf32>, i32 -> vector<8x256xf32>
      %cst_13 = arith.constant 0.000000e+00 : f32
      %23 = vector.broadcast %cst_13 : f32 to vector<8x256xf32>
      %24 = arith.select %4, %23, %22 : vector<8x256xi1>, vector<8x256xf32>
      %25 = tpu.concatenate %21, %16, %24 in 0 : vector<8x256xf32>, vector<8x256xf32>, vector<8x256xf32> -> vector<24x256xf32>
      %cst_14 = arith.constant dense<0.000000e+00> : vector<16x256xf32>
      %26 = tpu.matmul %18, %25, %cst_14 {dimension_numbers = #tpu.dot_dimension_numbers<[1], [0], [0], [1], [0, 0, 1, 1], [], []>} : vector<16x24xf32>, vector<24x256xf32>, vector<16x256xf32> -> vector<16x256xf32>
      %27 = arith.addf %8, %26 : vector<16x256xf32>
      %c1_i32_15 = arith.constant 1 : i32
      %28 = arith.addi %11, %c1_i32_15 : i32
      %c0_16 = arith.constant 0 : index
      %29 = arith.index_cast %28 : i32 to index
      %c0_17 = arith.constant 0 : index
      %c0_18 = arith.constant 0 : index
      %30 = vector.load %arg2[%c0_16, %29, %c0_17, %c0_18] : memref<1x130x8x256xbf16, #tpu.memory_space<vmem>>, vector<1x1x8x256xbf16>
      %31 = vector.shape_cast %30 : vector<1x1x8x256xbf16> to vector<8x256xbf16>
      %32 = arith.extf %31 : vector<8x256xbf16> to vector<8x256xf32>
      %33 = vector.extract_strided_slice %5 {offsets = [1, 0, 0], sizes = [1, 16, 24], strides = [1, 1, 1]} : vector<3x16x24xf32> to vector<1x16x24xf32>
      %34 = vector.shape_cast %33 : vector<1x16x24xf32> to vector<16x24xf32>
      %c1_i32_19 = arith.constant 1 : i32
      %35 = tpu.dynamic_rotate %32 by %c1_i32_19 dim 1 : vector<8x256xf32>, i32 -> vector<8x256xf32>
      %cst_20 = arith.constant 0.000000e+00 : f32
      %36 = vector.broadcast %cst_20 : f32 to vector<8x256xf32>
      %37 = arith.select %2, %36, %35 : vector<8x256xi1>, vector<8x256xf32>
      %c255_i32_21 = arith.constant 255 : i32
      %38 = tpu.dynamic_rotate %32 by %c255_i32_21 dim 1 : vector<8x256xf32>, i32 -> vector<8x256xf32>
      %cst_22 = arith.constant 0.000000e+00 : f32
      %39 = vector.broadcast %cst_22 : f32 to vector<8x256xf32>
      %40 = arith.select %4, %39, %38 : vector<8x256xi1>, vector<8x256xf32>
      %41 = tpu.concatenate %37, %32, %40 in 0 : vector<8x256xf32>, vector<8x256xf32>, vector<8x256xf32> -> vector<24x256xf32>
      %cst_23 = arith.constant dense<0.000000e+00> : vector<16x256xf32>
      %42 = tpu.matmul %34, %41, %cst_23 {dimension_numbers = #tpu.dot_dimension_numbers<[1], [0], [0], [1], [0, 0, 1, 1], [], []>} : vector<16x24xf32>, vector<24x256xf32>, vector<16x256xf32> -> vector<16x256xf32>
      %43 = arith.addf %27, %42 : vector<16x256xf32>
      %c2_i32 = arith.constant 2 : i32
      %44 = arith.addi %11, %c2_i32 : i32
      %c0_24 = arith.constant 0 : index
      %45 = arith.index_cast %44 : i32 to index
      %c0_25 = arith.constant 0 : index
      %c0_26 = arith.constant 0 : index
      %46 = vector.load %arg2[%c0_24, %45, %c0_25, %c0_26] : memref<1x130x8x256xbf16, #tpu.memory_space<vmem>>, vector<1x1x8x256xbf16>
      %47 = vector.shape_cast %46 : vector<1x1x8x256xbf16> to vector<8x256xbf16>
      %48 = arith.extf %47 : vector<8x256xbf16> to vector<8x256xf32>
      %49 = vector.extract_strided_slice %5 {offsets = [2, 0, 0], sizes = [1, 16, 24], strides = [1, 1, 1]} : vector<3x16x24xf32> to vector<1x16x24xf32>
      %50 = vector.shape_cast %49 : vector<1x16x24xf32> to vector<16x24xf32>
      %c1_i32_27 = arith.constant 1 : i32
      %51 = tpu.dynamic_rotate %48 by %c1_i32_27 dim 1 : vector<8x256xf32>, i32 -> vector<8x256xf32>
      %cst_28 = arith.constant 0.000000e+00 : f32
      %52 = vector.broadcast %cst_28 : f32 to vector<8x256xf32>
      %53 = arith.select %2, %52, %51 : vector<8x256xi1>, vector<8x256xf32>
      %c255_i32_29 = arith.constant 255 : i32
      %54 = tpu.dynamic_rotate %48 by %c255_i32_29 dim 1 : vector<8x256xf32>, i32 -> vector<8x256xf32>
      %cst_30 = arith.constant 0.000000e+00 : f32
      %55 = vector.broadcast %cst_30 : f32 to vector<8x256xf32>
      %56 = arith.select %4, %55, %54 : vector<8x256xi1>, vector<8x256xf32>
      %57 = tpu.concatenate %53, %48, %56 in 0 : vector<8x256xf32>, vector<8x256xf32>, vector<8x256xf32> -> vector<24x256xf32>
      %cst_31 = arith.constant dense<0.000000e+00> : vector<16x256xf32>
      %58 = tpu.matmul %50, %57, %cst_31 {dimension_numbers = #tpu.dot_dimension_numbers<[1], [0], [0], [1], [0, 0, 1, 1], [], []>} : vector<16x24xf32>, vector<24x256xf32>, vector<16x256xf32> -> vector<16x256xf32>
      %59 = arith.addf %43, %58 : vector<16x256xf32>
      %cst_32 = arith.constant 0.000000e+00 : f32
      %60 = vector.broadcast %cst_32 : f32 to vector<16x256xf32>
      %61 = arith.maximumf %59, %60 : vector<16x256xf32>
      %62 = vector.extract_strided_slice %61 {offsets = [0, 0], sizes = [8, 256], strides = [1, 1]} : vector<16x256xf32> to vector<8x256xf32>
      %63 = vector.extract_strided_slice %61 {offsets = [8, 0], sizes = [8, 256], strides = [1, 1]} : vector<16x256xf32> to vector<8x256xf32>
      %64 = arith.truncf %62 : vector<8x256xf32> to vector<8x256xbf16>
      %c2_i32_33 = arith.constant 2 : i32
      %65 = arith.muli %c2_i32_33, %arg6 : i32
      %c0_34 = arith.constant 0 : index
      %66 = arith.index_cast %65 : i32 to index
      %c0_35 = arith.constant 0 : index
      %c0_36 = arith.constant 0 : index
      %67 = vector.load %arg5[%c0_34, %66, %c0_35, %c0_36] : memref<1x256x8x256xbf16, #tpu.memory_space<vmem>>, vector<1x1x8x256xbf16>
      %68 = vector.shape_cast %67 : vector<1x1x8x256xbf16> to vector<8x256xbf16>
      %69 = vector.shape_cast %64 : vector<8x256xbf16> to vector<1x1x8x256xbf16>
      tpu.vector_store %arg5[%c0_34, %66, %c0_35, %c0_36], %69 {strides = array<i32>} : memref<1x256x8x256xbf16, #tpu.memory_space<vmem>>, vector<1x1x8x256xbf16>,
      %70 = arith.truncf %63 : vector<8x256xf32> to vector<8x256xbf16>
      %c2_i32_37 = arith.constant 2 : i32
      %71 = arith.muli %c2_i32_37, %arg6 : i32
      %c1_i32_38 = arith.constant 1 : i32
      %72 = arith.addi %71, %c1_i32_38 : i32
      %c0_39 = arith.constant 0 : index
      %73 = arith.index_cast %72 : i32 to index
      %c0_40 = arith.constant 0 : index
      %c0_41 = arith.constant 0 : index
      %74 = vector.load %arg5[%c0_39, %73, %c0_40, %c0_41] : memref<1x256x8x256xbf16, #tpu.memory_space<vmem>>, vector<1x1x8x256xbf16>
      %75 = vector.shape_cast %74 : vector<1x1x8x256xbf16> to vector<8x256xbf16>
      %76 = vector.shape_cast %70 : vector<8x256xbf16> to vector<1x1x8x256xbf16>
      tpu.vector_store %arg5[%c0_39, %73, %c0_40, %c0_41], %76 {strides = array<i32>} : memref<1x256x8x256xbf16, #tpu.memory_space<vmem>>, vector<1x1x8x256xbf16>,
    }
    %c128_i32_5 = arith.constant 128 : i32
    return
  }
  func.func @transform_0(%arg0: i32, %arg1: i32) -> (i32, i32, i32, i32) {
    %c0_i32 = arith.constant 0 : i32
    %c0_i32_0 = arith.constant 0 : i32
    %c0_i32_1 = arith.constant 0 : i32
    %c0_i32_2 = arith.constant 0 : i32
    return %arg0, %c0_i32, %c0_i32_0, %c0_i32_1 : i32, i32, i32, i32
  }
  func.func @transform_1(%arg0: i32, %arg1: i32) -> (i32, i32, i32) {
    %c0_i32 = arith.constant 0 : i32
    %c0_i32_0 = arith.constant 0 : i32
    %c0_i32_1 = arith.constant 0 : i32
    %c0_i32_2 = arith.constant 0 : i32
    return %c0_i32, %c0_i32_0, %c0_i32_1 : i32, i32, i32
  }
  func.func @transform_2(%arg0: i32, %arg1: i32) -> (i32, i32) {
    %c0_i32 = arith.constant 0 : i32
    %c0_i32_0 = arith.constant 0 : i32
    %c0_i32_1 = arith.constant 0 : i32
    return %c0_i32, %c0_i32_0 : i32, i32
  }
  func.func @transform_3(%arg0: i32, %arg1: i32) -> (i32, i32, i32, i32) {
    %c0_i32 = arith.constant 0 : i32
    %c0_i32_0 = arith.constant 0 : i32
    %c0_i32_1 = arith.constant 0 : i32
    return %arg0, %arg1, %c0_i32, %c0_i32_0 : i32, i32, i32, i32
  }
}

module attributes {stable_mosaic.version = 11 : i64} {
  func.func @_up2_conv3x3_kernel(%arg0: i32, %arg1: i32, %arg2: memref<1x258x8x512xbf16, #tpu.memory_space<vmem>>, %arg3: memref<3x16x24xf32, #tpu.memory_space<vmem>>, %arg4: memref<16x1xf32, #tpu.memory_space<vmem>>, %arg5: memref<2x8xf32, #tpu.memory_space<vmem>>, %arg6: memref<2x1xf32, #tpu.memory_space<vmem>>, %arg7: memref<1x256x2x512xf32, #tpu.memory_space<vmem>>) attributes {dimension_semantics = [#tpu.dimension_semantics<parallel>, #tpu.dimension_semantics<arbitrary>], iteration_bounds = array<i64: 2, 2>, scalar_prefetch = 0 : i64, scratch_operands = 0 : i64, tpu.core_type = #tpu.core_type<tc>, window_params = [{transform_indices = @transform_0, window_bounds = array<i64: 1, 258, 8, 512>}, {pipeline_mode = #tpu.pipeline_mode<synchronous>, transform_indices = @transform_1, window_bounds = array<i64: 3, 16, 24>}, {pipeline_mode = #tpu.pipeline_mode<synchronous>, transform_indices = @transform_2, window_bounds = array<i64: 16, 1>}, {pipeline_mode = #tpu.pipeline_mode<synchronous>, transform_indices = @transform_3, window_bounds = array<i64: 2, 8>}, {pipeline_mode = #tpu.pipeline_mode<synchronous>, transform_indices = @transform_4, window_bounds = array<i64: 2, 1>}, {transform_indices = @transform_5, window_bounds = array<i64: 1, 256, 2, 512>}]} {
    %0 = tpu.iota {dimensions = array<i32: 1>} : vector<8x512xi32>
    %c0_i32 = arith.constant 0 : i32
    %1 = vector.broadcast %c0_i32 : i32 to vector<8x512xi32>
    %2 = arith.cmpi eq, %0, %1 : vector<8x512xi32>
    %c511_i32 = arith.constant 511 : i32
    %3 = vector.broadcast %c511_i32 : i32 to vector<8x512xi32>
    %4 = arith.cmpi eq, %0, %3 : vector<8x512xi32>
    %c0 = arith.constant 0 : index
    %c0_0 = arith.constant 0 : index
    %c0_1 = arith.constant 0 : index
    %5 = vector.load %arg3[%c0, %c0_0, %c0_1] : memref<3x16x24xf32, #tpu.memory_space<vmem>>, vector<3x16x24xf32>
    %c0_2 = arith.constant 0 : index
    %c0_3 = arith.constant 0 : index
    %6 = vector.load %arg4[%c0_2, %c0_3] : memref<16x1xf32, #tpu.memory_space<vmem>>, vector<16x1xf32>
    %7 = vector.shape_cast %6 : vector<16x1xf32> to vector<16x1xf32>
    %8 = vector.broadcast %7 : vector<16x1xf32> to vector<16x512xf32>
    %c0_4 = arith.constant 0 : index
    %c0_5 = arith.constant 0 : index
    %9 = vector.load %arg5[%c0_4, %c0_5] : memref<2x8xf32, #tpu.memory_space<vmem>>, vector<2x8xf32>
    %c0_6 = arith.constant 0 : index
    %c0_7 = arith.constant 0 : index
    %10 = vector.load %arg6[%c0_6, %c0_7] : memref<2x1xf32, #tpu.memory_space<vmem>>, vector<2x1xf32>
    %11 = vector.shape_cast %10 : vector<2x1xf32> to vector<2x1xf32>
    %12 = vector.broadcast %11 : vector<2x1xf32> to vector<2x512xf32>
    %c0_i32_8 = arith.constant 0 : i32
    %c128_i32 = arith.constant 128 : i32
    %13 = arith.addi %c0_i32_8, %c128_i32 : i32
    %c1_i32 = arith.constant 1 : i32
    scf.for %arg8 = %c0_i32_8 to %13 step %c1_i32  : i32 {
      %c128_i32_10 = arith.constant 128 : i32
      %14 = arith.muli %arg1, %c128_i32_10 : i32
      %15 = arith.addi %14, %arg8 : i32
      %c0_i32_11 = arith.constant 0 : i32
      %16 = arith.addi %15, %c0_i32_11 : i32
      %c0_12 = arith.constant 0 : index
      %17 = arith.index_cast %16 : i32 to index
      %c0_13 = arith.constant 0 : index
      %c0_14 = arith.constant 0 : index
      %18 = vector.load %arg2[%c0_12, %17, %c0_13, %c0_14] : memref<1x258x8x512xbf16, #tpu.memory_space<vmem>>, vector<1x1x8x512xbf16>
      %19 = vector.shape_cast %18 : vector<1x1x8x512xbf16> to vector<8x512xbf16>
      %20 = arith.extf %19 : vector<8x512xbf16> to vector<8x512xf32>
      %21 = vector.extract_strided_slice %5 {offsets = [0, 0, 0], sizes = [1, 16, 24], strides = [1, 1, 1]} : vector<3x16x24xf32> to vector<1x16x24xf32>
      %22 = vector.shape_cast %21 : vector<1x16x24xf32> to vector<16x24xf32>
      %c1_i32_15 = arith.constant 1 : i32
      %23 = tpu.dynamic_rotate %20 by %c1_i32_15 dim 1 : vector<8x512xf32>, i32 -> vector<8x512xf32>
      %cst = arith.constant 0.000000e+00 : f32
      %24 = vector.broadcast %cst : f32 to vector<8x512xf32>
      %25 = arith.select %2, %24, %23 : vector<8x512xi1>, vector<8x512xf32>
      %c511_i32_16 = arith.constant 511 : i32
      %26 = tpu.dynamic_rotate %20 by %c511_i32_16 dim 1 : vector<8x512xf32>, i32 -> vector<8x512xf32>
      %cst_17 = arith.constant 0.000000e+00 : f32
      %27 = vector.broadcast %cst_17 : f32 to vector<8x512xf32>
      %28 = arith.select %4, %27, %26 : vector<8x512xi1>, vector<8x512xf32>
      %29 = tpu.concatenate %25, %20, %28 in 0 : vector<8x512xf32>, vector<8x512xf32>, vector<8x512xf32> -> vector<24x512xf32>
      %cst_18 = arith.constant dense<0.000000e+00> : vector<16x512xf32>
      %30 = tpu.matmul %22, %29, %cst_18 {dimension_numbers = #tpu.dot_dimension_numbers<[1], [0], [0], [1], [0, 0, 1, 1], [], []>} : vector<16x24xf32>, vector<24x512xf32>, vector<16x512xf32> -> vector<16x512xf32>
      %31 = arith.addf %8, %30 : vector<16x512xf32>
      %c1_i32_19 = arith.constant 1 : i32
      %32 = arith.addi %15, %c1_i32_19 : i32
      %c0_20 = arith.constant 0 : index
      %33 = arith.index_cast %32 : i32 to index
      %c0_21 = arith.constant 0 : index
      %c0_22 = arith.constant 0 : index
      %34 = vector.load %arg2[%c0_20, %33, %c0_21, %c0_22] : memref<1x258x8x512xbf16, #tpu.memory_space<vmem>>, vector<1x1x8x512xbf16>
      %35 = vector.shape_cast %34 : vector<1x1x8x512xbf16> to vector<8x512xbf16>
      %36 = arith.extf %35 : vector<8x512xbf16> to vector<8x512xf32>
      %37 = vector.extract_strided_slice %5 {offsets = [1, 0, 0], sizes = [1, 16, 24], strides = [1, 1, 1]} : vector<3x16x24xf32> to vector<1x16x24xf32>
      %38 = vector.shape_cast %37 : vector<1x16x24xf32> to vector<16x24xf32>
      %c1_i32_23 = arith.constant 1 : i32
      %39 = tpu.dynamic_rotate %36 by %c1_i32_23 dim 1 : vector<8x512xf32>, i32 -> vector<8x512xf32>
      %cst_24 = arith.constant 0.000000e+00 : f32
      %40 = vector.broadcast %cst_24 : f32 to vector<8x512xf32>
      %41 = arith.select %2, %40, %39 : vector<8x512xi1>, vector<8x512xf32>
      %c511_i32_25 = arith.constant 511 : i32
      %42 = tpu.dynamic_rotate %36 by %c511_i32_25 dim 1 : vector<8x512xf32>, i32 -> vector<8x512xf32>
      %cst_26 = arith.constant 0.000000e+00 : f32
      %43 = vector.broadcast %cst_26 : f32 to vector<8x512xf32>
      %44 = arith.select %4, %43, %42 : vector<8x512xi1>, vector<8x512xf32>
      %45 = tpu.concatenate %41, %36, %44 in 0 : vector<8x512xf32>, vector<8x512xf32>, vector<8x512xf32> -> vector<24x512xf32>
      %cst_27 = arith.constant dense<0.000000e+00> : vector<16x512xf32>
      %46 = tpu.matmul %38, %45, %cst_27 {dimension_numbers = #tpu.dot_dimension_numbers<[1], [0], [0], [1], [0, 0, 1, 1], [], []>} : vector<16x24xf32>, vector<24x512xf32>, vector<16x512xf32> -> vector<16x512xf32>
      %47 = arith.addf %31, %46 : vector<16x512xf32>
      %c2_i32 = arith.constant 2 : i32
      %48 = arith.addi %15, %c2_i32 : i32
      %c0_28 = arith.constant 0 : index
      %49 = arith.index_cast %48 : i32 to index
      %c0_29 = arith.constant 0 : index
      %c0_30 = arith.constant 0 : index
      %50 = vector.load %arg2[%c0_28, %49, %c0_29, %c0_30] : memref<1x258x8x512xbf16, #tpu.memory_space<vmem>>, vector<1x1x8x512xbf16>
      %51 = vector.shape_cast %50 : vector<1x1x8x512xbf16> to vector<8x512xbf16>
      %52 = arith.extf %51 : vector<8x512xbf16> to vector<8x512xf32>
      %53 = vector.extract_strided_slice %5 {offsets = [2, 0, 0], sizes = [1, 16, 24], strides = [1, 1, 1]} : vector<3x16x24xf32> to vector<1x16x24xf32>
      %54 = vector.shape_cast %53 : vector<1x16x24xf32> to vector<16x24xf32>
      %c1_i32_31 = arith.constant 1 : i32
      %55 = tpu.dynamic_rotate %52 by %c1_i32_31 dim 1 : vector<8x512xf32>, i32 -> vector<8x512xf32>
      %cst_32 = arith.constant 0.000000e+00 : f32
      %56 = vector.broadcast %cst_32 : f32 to vector<8x512xf32>
      %57 = arith.select %2, %56, %55 : vector<8x512xi1>, vector<8x512xf32>
      %c511_i32_33 = arith.constant 511 : i32
      %58 = tpu.dynamic_rotate %52 by %c511_i32_33 dim 1 : vector<8x512xf32>, i32 -> vector<8x512xf32>
      %cst_34 = arith.constant 0.000000e+00 : f32
      %59 = vector.broadcast %cst_34 : f32 to vector<8x512xf32>
      %60 = arith.select %4, %59, %58 : vector<8x512xi1>, vector<8x512xf32>
      %61 = tpu.concatenate %57, %52, %60 in 0 : vector<8x512xf32>, vector<8x512xf32>, vector<8x512xf32> -> vector<24x512xf32>
      %cst_35 = arith.constant dense<0.000000e+00> : vector<16x512xf32>
      %62 = tpu.matmul %54, %61, %cst_35 {dimension_numbers = #tpu.dot_dimension_numbers<[1], [0], [0], [1], [0, 0, 1, 1], [], []>} : vector<16x24xf32>, vector<24x512xf32>, vector<16x512xf32> -> vector<16x512xf32>
      %63 = arith.addf %47, %62 : vector<16x512xf32>
      %cst_36 = arith.constant 0.000000e+00 : f32
      %64 = vector.broadcast %cst_36 : f32 to vector<16x512xf32>
      %65 = arith.maximumf %63, %64 : vector<16x512xf32>
      %66 = vector.extract_strided_slice %65 {offsets = [0, 0], sizes = [8, 512], strides = [1, 1]} : vector<16x512xf32> to vector<8x512xf32>
      %67 = vector.extract_strided_slice %65 {offsets = [8, 0], sizes = [8, 512], strides = [1, 1]} : vector<16x512xf32> to vector<8x512xf32>
      %cst_37 = arith.constant dense<0.000000e+00> : vector<2x512xf32>
      %68 = tpu.matmul %9, %66, %cst_37 {dimension_numbers = #tpu.dot_dimension_numbers<[1], [0], [0], [1], [0, 0, 1, 1], [], []>} : vector<2x8xf32>, vector<8x512xf32>, vector<2x512xf32> -> vector<2x512xf32>
      %69 = arith.addf %68, %12 : vector<2x512xf32>
      %cst_38 = arith.constant dense<0.000000e+00> : vector<2x512xf32>
      %70 = tpu.matmul %9, %67, %cst_38 {dimension_numbers = #tpu.dot_dimension_numbers<[1], [0], [0], [1], [0, 0, 1, 1], [], []>} : vector<2x8xf32>, vector<8x512xf32>, vector<2x512xf32> -> vector<2x512xf32>
      %71 = arith.addf %70, %12 : vector<2x512xf32>
      %c2_i32_39 = arith.constant 2 : i32
      %72 = arith.muli %c2_i32_39, %arg8 : i32
      %c0_40 = arith.constant 0 : index
      %73 = arith.index_cast %72 : i32 to index
      %c0_41 = arith.constant 0 : index
      %c0_42 = arith.constant 0 : index
      %74 = vector.load %arg7[%c0_40, %73, %c0_41, %c0_42] : memref<1x256x2x512xf32, #tpu.memory_space<vmem>>, vector<1x1x2x512xf32>
      %75 = vector.shape_cast %74 : vector<1x1x2x512xf32> to vector<2x512xf32>
      %76 = vector.shape_cast %69 : vector<2x512xf32> to vector<1x1x2x512xf32>
      tpu.vector_store %arg7[%c0_40, %73, %c0_41, %c0_42], %76 {strides = array<i32>} : memref<1x256x2x512xf32, #tpu.memory_space<vmem>>, vector<1x1x2x512xf32>,
      %c2_i32_43 = arith.constant 2 : i32
      %77 = arith.muli %c2_i32_43, %arg8 : i32
      %c1_i32_44 = arith.constant 1 : i32
      %78 = arith.addi %77, %c1_i32_44 : i32
      %c0_45 = arith.constant 0 : index
      %79 = arith.index_cast %78 : i32 to index
      %c0_46 = arith.constant 0 : index
      %c0_47 = arith.constant 0 : index
      %80 = vector.load %arg7[%c0_45, %79, %c0_46, %c0_47] : memref<1x256x2x512xf32, #tpu.memory_space<vmem>>, vector<1x1x2x512xf32>
      %81 = vector.shape_cast %80 : vector<1x1x2x512xf32> to vector<2x512xf32>
      %82 = vector.shape_cast %71 : vector<2x512xf32> to vector<1x1x2x512xf32>
      tpu.vector_store %arg7[%c0_45, %79, %c0_46, %c0_47], %82 {strides = array<i32>} : memref<1x256x2x512xf32, #tpu.memory_space<vmem>>, vector<1x1x2x512xf32>,
    }
    %c128_i32_9 = arith.constant 128 : i32
    return
  }
  func.func @transform_0(%arg0: i32, %arg1: i32) -> (i32, i32, i32, i32) {
    %c0_i32 = arith.constant 0 : i32
    %c0_i32_0 = arith.constant 0 : i32
    %c0_i32_1 = arith.constant 0 : i32
    %c0_i32_2 = arith.constant 0 : i32
    return %arg0, %c0_i32, %c0_i32_0, %c0_i32_1 : i32, i32, i32, i32
  }
  func.func @transform_1(%arg0: i32, %arg1: i32) -> (i32, i32, i32) {
    %c0_i32 = arith.constant 0 : i32
    %c0_i32_0 = arith.constant 0 : i32
    %c0_i32_1 = arith.constant 0 : i32
    %c0_i32_2 = arith.constant 0 : i32
    return %c0_i32, %c0_i32_0, %c0_i32_1 : i32, i32, i32
  }
  func.func @transform_2(%arg0: i32, %arg1: i32) -> (i32, i32) {
    %c0_i32 = arith.constant 0 : i32
    %c0_i32_0 = arith.constant 0 : i32
    %c0_i32_1 = arith.constant 0 : i32
    return %c0_i32, %c0_i32_0 : i32, i32
  }
  func.func @transform_3(%arg0: i32, %arg1: i32) -> (i32, i32) {
    %c0_i32 = arith.constant 0 : i32
    %c0_i32_0 = arith.constant 0 : i32
    %c0_i32_1 = arith.constant 0 : i32
    return %c0_i32, %c0_i32_0 : i32, i32
  }
  func.func @transform_4(%arg0: i32, %arg1: i32) -> (i32, i32) {
    %c0_i32 = arith.constant 0 : i32
    %c0_i32_0 = arith.constant 0 : i32
    %c0_i32_1 = arith.constant 0 : i32
    return %c0_i32, %c0_i32_0 : i32, i32
  }
  func.func @transform_5(%arg0: i32, %arg1: i32) -> (i32, i32, i32, i32) {
    %c0_i32 = arith.constant 0 : i32
    %c0_i32_0 = arith.constant 0 : i32
    %c0_i32_1 = arith.constant 0 : i32
    return %arg0, %arg1, %c0_i32, %c0_i32_0 : i32, i32, i32, i32
  }
}

</mosaic_0001>

<bundles_post_ra>
// kernel: vitb16_head_forward.5
= control target key start
LH: loop header
LB: loop body
LE: loop exit
PB: predicated region body
PF: predicated region fallthrough
CT: control target
= control target key end

     0   :  { %8 = vsyncpa [#allocation3], 0  ;;  %s448_s0 = inlined_call_operand.hbm [shape: f32[2,32], index: 0, kind: input, shape index: {}]   ;;  %s449_s1 = inlined_call_operand.hbm [shape: f32[32,1024], index: 1, kind: input, shape index: {}]   ;;  %s450_s2 = inlined_call_operand.hbm [shape: f32[1,1024], index: 2, kind: input, shape index: {}]   ;;  %s451_s3 = inlined_call_operand.vmem [shape: f32[2,1024], index: 3, kind: output, shape index: {}]  }
   0x1   :  { %9 = vsyncpa [#allocation5], 0  ;;  %s25_s14 = sshll.u32 %s449_s1, 4  ;;  %s394_s15 = smov [#allocation4]   ;;  %s26_s14 = int_to_ptr.hbm [resolvable:$true] %s25_s14 }
   0x2   :  { %s27_s16 = sshll.u32 %s394_s15, 4  ;;  %s15_s19 = sshll.u32 %s448_s0, 4  ;;  %s28_s16 = int_to_ptr.vmem [resolvable:$true] %s27_s16  ;;  %s16_s19 = int_to_ptr.hbm [resolvable:$true] %s15_s19 }
   0x3   :  { %s395_s20 = smov 1024   ;;  %s396_s21 = smov 64  }
   0x4   :  { %33 = dma.hbm_to_vmem [thread:$0]  %s26_s14, 4096, %s28_s16, [#allocation5], %s395_s20, %s395_s20, %s396_s21  }
   0x5   :  { %s397_s22 = smov [#allocation2]   ;;  %s39_s26 = sshll.u32 %s450_s2, 4  ;;  %s40_s26 = int_to_ptr.hbm [resolvable:$true] %s39_s26 }
   0x6   :  { %s17_s23 = sshll.u32 %s397_s22, 4  ;;  %s398_s1 = smov [#allocation6]   ;;  %s18_s23 = int_to_ptr.vmem [resolvable:$true] %s17_s23 }
   0x7   :  { %20 = dma.hbm_to_vmem [thread:$0]  %s16_s19, 32, %s18_s23, [#allocation3]  }
   0x8   :  { %s41_s27 = sshll.u32 %s398_s1, 4  ;;  %s42_s27 = int_to_ptr.vmem [resolvable:$true] %s41_s27 }
   0x9   :  { %44 = dma.hbm_to_vmem [thread:$0]  %s40_s26, 128, %s42_s27, [#allocation5]  }
   0xa   :  { %390 = dma.done.wait [#allocation3], 32  }
   0xb   :  { %391 = vsyncadd [#allocation3], 4294967264 }
   0xc   :  { %392 = dma.done.wait [#allocation5], 4224  }
   0xd   :  { %393 = vsyncadd [#allocation5], 4294963072  ;;  %v84_v0 = vld [vmem:[#allocation4 + $0xd0] sm:$0xff]  ;;  %v85_v1 = vld [vmem:[#allocation4 + $0xd8] sm:$0xff]  ;;  %vm108_vm0 = vcmask 261120   ;;  %vm286_vm1 = vcmask 1041408  }
   0xe   :  { %v76_v2 = vld [vmem:[#allocation4 + $0x90] sm:$0xff]  ;;  %164 = vmatpush.msra.mxu2 %v84_v0  ;;  %184 = vmatpush.msra.mxu3 %v85_v1  ;;  %v77_v3 = vld [vmem:[#allocation4 + $0x98] sm:$0xff]  ;;  %v83_v6 = vld [vmem:[#allocation4 + $0xc8] sm:$0xff]  ;;  %vm288_vm2 = vcmask 1045508   ;;  %vm290_vm3 = vcmask 1043456  }
   0xf   :  { %v68_v4 = vld [vmem:[#allocation4 + $0x50] sm:$0xff]  ;;  %v69_v5 = vld [vmem:[#allocation4 + $0x58] sm:$0xff]  ;;  %144 = vmatpush.msra.mxu1 %v83_v6  ;;  %v82_v9 = vld [vmem:[#allocation4 + $0xc0] sm:$0xff] }
  0x10   :  { %165 = vmatpush.msra.mxu2 %v76_v2  ;;  %185 = vmatpush.msra.mxu3 %v77_v3  ;;  %v60_v7 = vld [vmem:[#allocation4 + $0x10] sm:$0xff]  ;;  %v61_v8 = vld [vmem:[#allocation4 + $0x18] sm:$0xff]  ;;  %v75_v10 = vld [vmem:[#allocation4 + $0x88] sm:$0xff] }
  0x11   :  { %v57_v11 = vld [vmem:[#allocation2] sm:$0x3]  ;;  %v88_v12 = vld [vmem:[#allocation4 + $0xf0] sm:$0xff]  ;;  %124 = vmatpush.msra.mxu0 %v82_v9  ;;  %145 = vmatpush.msra.mxu1 %v75_v10  ;;  %v74_v14 = vld [vmem:[#allocation4 + $0x80] sm:$0xff] }
  0x12   :  { %166 = vmatpush.msra.mxu2 %v68_v4  ;;  %186 = vmatpush.msra.mxu3 %v69_v5  ;;  %v89_v13 = vld [vmem:[#allocation4 + $0xf8] sm:$0xff]  ;;  %v67_v15 = vld [vmem:[#allocation4 + $0x48] sm:$0xff]  ;;  %v80_v16 = vld [vmem:[#allocation4 + $0xb0] sm:$0xff] }
  0x13   :  { %v81_v17 = vld [vmem:[#allocation4 + $0xb8] sm:$0xff]  ;;  %v66_v18 = vld [vmem:[#allocation4 + $0x40] sm:$0xff]  ;;  %v59_v19 = vld [vmem:[#allocation4 + $0x8] sm:$0xff]  ;;  %125 = vmatpush.msra.mxu0 %v74_v14  ;;  %146 = vmatpush.msra.mxu1 %v67_v15 }
  0x14   :  { %167 = vmatpush.msra.mxu2 %v60_v7  ;;  %187 = vmatpush.msra.mxu3 %v61_v8  ;;  %v72_v20 = vld [vmem:[#allocation4 + $0x70] sm:$0xff]  ;;  %v73_v21 = vld [vmem:[#allocation4 + $0x78] sm:$0xff]  ;;  %v58_v22 = vld [vmem:[#allocation4] sm:$0xff] }
  0x15   :  { %307 = vmatmul.msk.f32.vlgmr.msra.gmra.mxu2 %vm108_vm0, %v57_v11  ;;  %308 = vmatmul.msk.f32.vlgmr.msra.gmra.mxu3 %vm108_vm0, %v57_v11  ;;  %v87_v23 = vld [vmem:[#allocation4 + $0xe8] sm:$0xff]  ;;  %v64_v24 = vld [vmem:[#allocation4 + $0x30] sm:$0xff]  ;;  %v65_v25 = vld [vmem:[#allocation4 + $0x38] sm:$0xff] }
  0x16   :  { %244 = vmatpush.msrb.mxu2 %v88_v12  ;;  %264 = vmatpush.msrb.mxu3 %v89_v13  ;;  %v86_v26 = vld [vmem:[#allocation4 + $0xe0] sm:$0xff]  ;;  %v79_v27 = vld [vmem:[#allocation4 + $0xa8] sm:$0xff] }
  0x17   :  { %126 = vmatpush.msra.mxu0 %v66_v18  ;;  %147 = vmatpush.msra.mxu1 %v59_v19  ;;  %v78_v28 = vld [vmem:[#allocation4 + $0xa0] sm:$0xff]  ;;  %v71_v29 = vld [vmem:[#allocation4 + $0x68] sm:$0xff] }
  0x18   :  { %245 = vmatpush.msrb.mxu2 %v80_v16  ;;  %265 = vmatpush.msrb.mxu3 %v81_v17  ;;  %v70_v30 = vld [vmem:[#allocation4 + $0x60] sm:$0xff]  ;;  %v63_v31 = vld [vmem:[#allocation4 + $0x28] sm:$0xff] }
  0x19   :  { %306 = vmatmul.msk.f32.vlgmr.msra.gmra.mxu1 %vm108_vm0, %v57_v11  ;;  %127 = vmatpush.msra.mxu0 %v58_v22  ;;  %v62_v32 = vld [vmem:[#allocation4 + $0x20] sm:$0xff] }
  0x1a   :  { %246 = vmatpush.msrb.mxu2 %v72_v20  ;;  %266 = vmatpush.msrb.mxu3 %v73_v21  ;;  %v90_v33 = vld [vmem:[#allocation6] sm:$0xff] }
  0x1b   :  { %224 = vmatpush.msrb.mxu1 %v87_v23  ;;  %305 = vmatmul.msk.f32.vlgmr.msra.gmra.mxu0 %vm108_vm0, %v57_v11  ;;  %v93_v34 = vperm.slane %v90_v33, 1  ;;  %v94_v35 = vperm.slane %v90_v33, 2  ;;  %v95_v36 = vperm.slane %v90_v33, 3  ;;  %v92_v37 = vperm.slane %v90_v33, 0 }
  0x1c   :  { %247 = vmatpush.msrb.mxu2 %v64_v24  ;;  %267 = vmatpush.msrb.mxu3 %v65_v25  ;;  %v97_v50 = vperm.slane %v90_v33, 5  ;;  %v98_v53 = vperm.slane %v90_v33, 6  ;;  %v99_v54 = vperm.slane %v90_v33, 7  ;;  %v96_v56 = vperm.slane %v90_v33, 4 }
  0x1d   :  { %204 = vmatpush.msrb.mxu0 %v86_v26  ;;  %225 = vmatpush.msrb.mxu1 %v79_v27 }
  0x1e   :  { %311 = vmatmul.msk.f32.vlgmr.msrb.gmra.mxu2 %vm108_vm0, %v57_v11  ;;  %312 = vmatmul.msk.f32.vlgmr.msrb.gmra.mxu3 %vm108_vm0, %v57_v11 }
  0x1f   :  { %205 = vmatpush.msrb.mxu0 %v78_v28  ;;  %226 = vmatpush.msrb.mxu1 %v71_v29 }
  0x21   :  { %206 = vmatpush.msrb.mxu0 %v70_v30  ;;  %227 = vmatpush.msrb.mxu1 %v63_v31 }
  0x22   :  { %310 = vmatmul.msk.f32.vlgmr.msrb.gmra.mxu1 %vm108_vm0, %v57_v11 }
  0x23   :  { %207 = vmatpush.msrb.mxu0 %v62_v32 }
  0x24   :  { %309 = vmatmul.msk.f32.vlgmr.msrb.gmra.mxu0 %vm108_vm0, %v57_v11 }
  0x96   :  { %v149_v38 = vpop.f32.mrf.mxu1 }
  0x97   :  { %v150_v40 = vadd.f32 %v149_v38, %v93_v34 }
  0x98   :  { %v169_v39 = vpop.f32.mrf.mxu2  ;;  %v189_v42 = vpop.f32.mrf.mxu3 }
  0x99   :  { %v170_v41 = vadd.f32 %v169_v39, %v94_v35  ;;  %v190_v43 = vadd.f32 %v189_v42, %v95_v36  ;;  %v129_v44 = vpop.f32.mrf.mxu0  ;;  %v280_v45 = vrot.slane %v150_v40, 6 }
  0x9a   :  { %v130_v47 = vadd.f32 %v129_v44, %v92_v37 }
  0x9b   :  { %v281_v46 = vrot.slane %v170_v41, 4  ;;  %v282_v48 = vrot.slane %v190_v43, 2 }
  0x9c   :  { %v287_v49 = vsel %vm286_vm1, %v130_v47, %v280_v45 }
  0x9d   :  { %v289_v51 = vsel %vm288_vm2, %v281_v46, %v282_v48 }
  0x9e   :  { %v291_v52 = vsel %vm290_vm3, %v287_v49, %v289_v51 }
  0x9f   :  { %297 = vst [vmem:[%s451_s3] sm:$0xff] %v291_v52  ;;  %v229_v55 = vpop.f32.mrf.mxu1 }
  0xa0   :  { %v230_v57 = vadd.f32 %v229_v55, %v97_v50 }
  0xa1   :  { %v249_v58 = vpop.f32.mrf.mxu2  ;;  %v269_v59 = vpop.f32.mrf.mxu3 }
  0xa2   :  { %v283_v60 = vrot.slane %v230_v57, 6  ;;  %v250_v61 = vadd.f32 %v249_v58, %v98_v53  ;;  %v270_v62 = vadd.f32 %v269_v59, %v99_v54  ;;  %v209_v63 = vpop.f32.mrf.mxu0 }
  0xa3   :  { %v210_v0 = vadd.f32 %v209_v63, %v96_v56 }
  0xa4   :  { %v284_v1 = vrot.slane %v250_v61, 4  ;;  %v285_v2 = vrot.slane %v270_v62, 2 }
  0xa5   :  { %v292_v3 = vsel %vm286_vm1, %v210_v0, %v283_v60 }
  0xa6   :  { %v293_v4 = vsel %vm288_vm2, %v284_v1, %v285_v2 }
  0xa7   :  { %v294_v5 = vsel %vm290_vm3, %v292_v3, %v293_v4 }
  0xa8   :  { %298 = vst [vmem:[%s451_s3 + $0x8] sm:$0xff] %v294_v5 }
  0xa9   :  { %303 = vsyncpa [#allocation3], 1 }
  0xaa   :  { %304 = vsyncpa [#allocation5], 1 }

// kernel: vitb16_head_forward.6
= control target key start
LH: loop header
LB: loop body
LE: loop exit
PB: predicated region body
PF: predicated region fallthrough
CT: control target
= control target key end

     0   :  { %s657_s12 = smov 0   ;;  %s659_s13 = smov 0   ;;  %s764_s0 = inlined_call_operand.vmem [shape: bf16[2,34,8,64], index: 0, kind: input, shape index: {}]   ;;  %s765_s1 = inlined_call_operand.vmem [shape: f32[3,16,24], index: 1, kind: input, shape index: {}]   ;;  %s766_s2 = inlined_call_operand.vmem [shape: f32[16,1], index: 2, kind: input, shape index: {}]   ;;  %s767_s3 = inlined_call_operand.vmem [shape: bf16[2,64,8,64], index: 3, kind: output, shape index: {}]  }
   0x1   :  { %s661_s14 = smov 0  }
   0x2 LB: > { %s25_s15 = sadd.s32 1, %s623_s13  ;;  %p501_p0 = scmp.ge.s32.totalorder %s627_s14, 1  ;;  %s627_s14 = sphi %s661_s14, %s13_s14   ;;  %s623_s13 = sphi %s659_s13, %s769_s13   ;;  %s619_s12 = sphi %s657_s12, %s768_s12  }
   0x3   : > { %p27_p1 = scmp.ge.s32.totalorder %s25_s15, 2  ;;  %p151_p2 = scmp.lt.s32.totalorder %s627_s14, 3 }
   0x5   : > { %s771_s15 = smov (%p27_p1, %s25_s15), 0  ;;  %p152_p3 = pnand %p501_p0, %p151_p2 }
   0x6   : > { %p179_p4 = scmp.lt.s32.totalorder (!%p152_p3), %s619_s12, 1  ;;  %s727_s16 = smov (!%p152_p3), 0  }
   0x7   : > { %155 = sbr.rel (%p152_p3) target bundleno = 650 (0x28a), region = 32 }
   0xc   : > { %v204_v0 = vld [vmem:[%s766_s2] sm:$0xff]  ;;  %v633_v1 = vmov 0   ;;  %s773_s12 = smov (!%p179_p4, %s619_s12), 1  ;;  %v205_v2 = vld [vmem:[%s766_s2 + $0x8] sm:$0xff]  ;;  %v194_v3 = vlaneseq  ;;  %v706_v7 = vld [vmem:[%s765_s1 + $0x10] sm:$0xff] }
   0xd   : > { %580 = vset.pattern.permute.xlu0 %v633_v1  ;;  %s543_s18 = smul.u32 136, %s773_s12  ;;  %s535_s19 = sshll.u32 %s773_s12, 8  ;;  %v696_v5 = vld [vmem:[%s765_s1] sm:$0xff]  ;;  %v701_v6 = vld [vmem:[%s765_s1 + $0x8] sm:$0xff]  ;;  %v711_v8 = vld [vmem:[%s765_s1 + $0x18] sm:$0xff] }
   0xe   : > { %208 = vperm.xlu0 %580, %v204_v0   ;;  %s681_s22 = scalar_lea.vmem %s767_s3, %s535_s19  ;;  %v691_v4 = vand.u32 127, %v194_v3  ;;  %v716_v9 = vld [vmem:[%s765_s1 + $0x20] sm:$0xff]  ;;  %v721_v10 = vld [vmem:[%s765_s1 + $0x28] sm:$0xff] }
   0xf   : > { %s686_s25 = scalar_lea.vmem %s764_s0, %s543_s18 }
  0x16   : > { %213 = vperm.xlu0 %580, %v205_v2  }
  0x80   : > { %v723_v11 = vpop.permute.xlu0 %208 }
  0x88   : > { %v725_v12 = vpop.permute.xlu0 %213 }
  0x89 LB: >> { %s505_s17 = sshll.u32 %s631_s16, 2  ;;  %s634_s19 = smov 64   ;;  %vm228_vm0 = vcmask 1048064   ;;  %vm538_vm1 = vcmp.ne.s32.totalorder %v691_v4, 63  ;;  %vm539_vm2 = vcmp.ne.s32.totalorder %v691_v4, 0  ;;  %vm244_vm3 = vcmask 195584   ;;  %s631_s16 = sphi %s727_s16, %s221_s16  }
  0x8a   : >> { %s225_s18 = scalar_lea.vmem %s686_s25, %s505_s17  ;;  %s635_s20 = smov 65   ;;  %vm384_vm4 = vcmask 519168  }
  0x8b   : >> { %v226_v13 = vld [vmem:[%s225_s18] sm:$0xff]   ;;  %v521_v14 = vld [vmem:[%s225_s18 + $0x8] sm:$0xf]  ;;  %s636_s21 = smov 127   ;;  %s536_s23 = sshll.u32 %s631_s16, 3 }
  0x8c   : >> { %v227_v15 = vunpack.c.l.bf16 %v226_v13  ;;  %v331_v16 = vunpack.c.l.bf16 %v521_v14  ;;  %v280_v18 = vunpack.c.h.bf16 %v226_v13  ;;  %s383_s24 = scalar_lea.vmem %s681_s22, %s536_s23  ;;  %s221_s16 = sadd.s32 1, %s631_s16  }
  0x8d   : >> { %p218_p5 = scmp.ge.s32.totalorder %s221_s16, 32  }
  0x8e   : >> { %v581_v17 = vpack.i.bf16 %v227_v15, %v331_v16 }
  0x90   : >> { %582 = vrot.lane.b32.xlu0 %v581_v17, %s634_s19 }
  0x98   : >> { %281 = vrot.lane.b32.xlu0 %v280_v18, %s634_s19 }
 0x102   : >> { %v583_v19 = vpop.permute.xlu0 %582 }
 0x103   : >> { %v585_v20 = vunpack.i.h.bf16 %v583_v19  ;;  %v584_v21 = vunpack.i.l.bf16 %v583_v19 }
 0x105   : >> { %v231_v22 = vsel %vm228_vm0, %v585_v20, %v227_v15  ;;  %v334_v23 = vsel %vm228_vm0, %v584_v21, %v331_v16 }
 0x106   : >> { %v586_v24 = vpack.i.bf16 %v231_v22, %v334_v23 }
 0x108   : >> { %587 = vrot.lane.b32.xlu1 %v586_v24, %s634_s19 }
 0x10a   : >> { %v282_v25 = vpop.permute.xlu0 %281 }
 0x10b   : >> { %v283_v26 = vsel %vm228_vm0, %v282_v25, %v280_v18 }
 0x110   : >> { %284 = vrot.lane.b32.xlu1 %v283_v26, %s634_s19 }
 0x17a   : >> { %v588_v27 = vpop.permute.xlu1 %587 }
 0x17b   : >> { %v590_v28 = vunpack.i.h.bf16 %v588_v27  ;;  %v589_v29 = vunpack.i.l.bf16 %v588_v27 }
 0x17d   : >> { %v234_v30 = vsel %vm228_vm0, %v590_v28, %v227_v15  ;;  %v337_v31 = vsel %vm228_vm0, %v589_v29, %v331_v16 }
 0x17e   : >> { %v596_v32 = vpack.i.bf16 %v234_v30, %v337_v31 }
 0x180   : >> { %597 = vrot.lane.b32.xlu0 %v596_v32, %s635_s20  ;;  %592 = vrot.lane.b32.xlu2 %v596_v32, %s636_s21 }
 0x182   : >> { %v285_v33 = vpop.permute.xlu1 %284 }
 0x183   : >> { %v286_v34 = vsel %vm228_vm0, %v285_v33, %v280_v18 }
 0x184   : >> { %288 = vrot.lane.b32.xlu1 %v286_v34, %s635_s20 }
 0x188   : >> { %292 = vrot.lane.b32.xlu2 %v286_v34, %s636_s21 }
 0x1da   : >> { %v593_v35 = vpop.permute.xlu2 %592 }
 0x1db   : >> { %v595_v36 = vunpack.i.h.bf16 %v593_v35  ;;  %v594_v37 = vunpack.i.l.bf16 %v593_v35 }
 0x1dd   : >> { %507 = vmatpush.msk.msra.mxu0 %vm538_vm1, %v595_v36  ;;  %540 = vmatpush.msk.msra.mxu3 %vm538_vm1, %v595_v36 }
 0x1de   : >> { %523 = vmatpush.msk.msra.mxu2 %vm538_vm1, %v594_v37 }
 0x1df   : >> { %265 = vmatpush.msra.mxu0 %v227_v15  ;;  %541 = vmatpush.msra.mxu3 %v227_v15 }
 0x1e0   : >> { %367 = vmatpush.msra.mxu2 %v331_v16 }
 0x1e2   : >> { %v293_v38 = vpop.permute.xlu2 %292 }
 0x1e3   : >> { %515 = vmatpush.msk.msra.mxu1 %vm538_vm1, %v293_v38 }
 0x1e5   : >> { %316 = vmatpush.msra.mxu1 %v280_v18 }
 0x1f2   : >> { %v598_v39 = vpop.permute.xlu0 %597 }
 0x1f3   : >> { %v600_v40 = vunpack.i.h.bf16 %v598_v39  ;;  %v599_v41 = vunpack.i.l.bf16 %v598_v39 }
 0x1f5   : >> { %509 = vmatpush.msk.msra.mxu0 %vm539_vm2, %v600_v40  ;;  %542 = vmatpush.msk.msra.mxu3 %vm539_vm2, %v600_v40 }
 0x1f6   : >> { %525 = vmatpush.msk.msra.mxu2 %vm539_vm2, %v599_v41  ;;  %v289_v42 = vpop.permute.xlu1 %288  ;;  %510 = vmatmul.msk.f32.vlgmr.msra.gmra.mxu0 %vm244_vm3, %v696_v5 }
 0x1f7   : >> { %526 = vmatmul.msk.f32.vlgmr.msra.gmra.mxu2 %vm244_vm3, %v716_v9  ;;  %517 = vmatpush.msk.msra.mxu1 %vm539_vm2, %v289_v42 }
 0x1f8   : >> { %511 = vmatmul.msk.f32.vlgmr.msra.gmra.mxu3 %vm244_vm3, %v701_v6  ;;  %518 = vmatmul.msk.f32.vlgmr.msra.gmra.mxu1 %vm244_vm3, %v706_v7 }
 0x1ff   : >> { %527 = vmatmul.msk.f32.gmra.mxu2 %vm244_vm3, %v721_v10 }
 0x200   : >> { %519 = vmatmul.msk.f32.gmra.mxu1 %vm244_vm3, %v711_v8 }
 0x273   : >> { %v268_v43 = vpop.f32.mrf.mxu0 }
 0x274   : >> { %v274_v44 = vadd.f32 %v268_v43, %v723_v11 }
 0x275   : >> { %v319_v45 = vpop.f32.mrf.mxu1 }
 0x276   : >> { %v325_v46 = vadd.f32 %v319_v45, %v274_v44 }
 0x27a   : >> { %v370_v47 = vpop.f32.mrf.mxu2 }
 0x27b   : >> { %v376_v48 = vadd.f32 %v370_v47, %v325_v46  ;;  %v271_v49 = vpop.f32.mrf.mxu3 }
 0x27c   : >> { %v275_v50 = vadd.f32 %v271_v49, %v725_v12 }
 0x27d   : >> { %v378_v51 = vmax.f32 %v376_v48, 0.0  ;;  %v322_v52 = vpop.f32.mrf.mxu1 }
 0x27e   : >> { %v326_v54 = vadd.f32 %v322_v52, %v275_v50 }
 0x27f   : >> { %v380_v53 = vpack.c.bf16 %v378_v51, %v378_v51 }
 0x281   : >> { %385 = vst.msk [vmem:[%s383_s24] sm:$0xf] %vm384_vm4, %v380_v53 }
 0x282   : >> { %v373_v55 = vpop.f32.mrf.mxu2 }
 0x283   : >> { %v377_v56 = vadd.f32 %v373_v55, %v326_v54 }
 0x285   : >> { %v379_v57 = vmax.f32 %v377_v56, 0.0  ;;  %220 = sbr.rel (!%p218_p5) target bundleno = 137 (0x89), region = 74 }
 0x287   : >> { %v386_v58 = vpack.c.bf16 %v379_v57, %v379_v57 }
 0x289   : >> { %532 = vst.msk [vmem:[%s383_s24 + $0x4] sm:$0xf] %vm384_vm4, %v386_v58 }
 0x28a PF: > { %s13_s14 = sadd.s32 1, %s627_s14   ;;  %s768_s12 = smov %s623_s13 }
 0x28b   : > { %p10_p6 = scmp.ge.s32.totalorder %s13_s14, 4   ;;  %s769_s13 = smov %s771_s15 }
 0x28d   :  { %12 = sbr.rel (!%p10_p6) target bundleno = 2 (0x2), region = 85 }

// kernel: vitb16_head_forward.7
= control target key start
LH: loop header
LB: loop body
LE: loop exit
PB: predicated region body
PF: predicated region fallthrough
CT: control target
= control target key end

     0   :  { %s616_s12 = smov 0   ;;  %s618_s13 = smov 0   ;;  %s725_s0 = inlined_call_operand.vmem [shape: bf16[2,66,8,128], index: 0, kind: input, shape index: {}]   ;;  %s726_s1 = inlined_call_operand.vmem [shape: f32[3,16,24], index: 1, kind: input, shape index: {}]   ;;  %s727_s2 = inlined_call_operand.vmem [shape: f32[16,1], index: 2, kind: input, shape index: {}]   ;;  %s728_s3 = inlined_call_operand.vmem [shape: bf16[2,128,8,128], index: 3, kind: output, shape index: {}]  }
   0x1   :  { %s620_s14 = smov 0  }
   0x2 LB: > { %s25_s15 = sadd.s32 1, %s583_s13  ;;  %p472_p0 = scmp.ge.s32.totalorder %s587_s14, 1  ;;  %s587_s14 = sphi %s620_s14, %s13_s14   ;;  %s583_s13 = sphi %s618_s13, %s730_s13   ;;  %s579_s12 = sphi %s616_s12, %s729_s12  }
   0x3   : > { %p27_p1 = scmp.ge.s32.totalorder %s25_s15, 2  ;;  %p151_p2 = scmp.lt.s32.totalorder %s587_s14, 3 }
   0x5   : > { %s732_s15 = smov (%p27_p1, %s25_s15), 0  ;;  %p152_p3 = pnand %p472_p0, %p151_p2 }
   0x6   : > { %p179_p4 = scmp.lt.s32.totalorder (!%p152_p3), %s579_s12, 1  ;;  %s686_s16 = smov (!%p152_p3), 0  }
   0x7   : > { %155 = sbr.rel (%p152_p3) target bundleno = 415 (0x19f), region = 32 }
   0xc   : > { %v204_v0 = vld [vmem:[%s727_s2] sm:$0xff]  ;;  %v593_v1 = vmov 0   ;;  %s734_s12 = smov (!%p179_p4, %s579_s12), 1  ;;  %v205_v2 = vld [vmem:[%s727_s2 + $0x8] sm:$0xff]  ;;  %v194_v3 = vlaneseq  ;;  %v665_v7 = vld [vmem:[%s726_s1 + $0x10] sm:$0xff] }
   0xd   : > { %550 = vset.pattern.permute.xlu0 %v593_v1  ;;  %s514_s18 = smul.u32 264, %s734_s12  ;;  %s506_s19 = sshll.u32 %s734_s12, 9  ;;  %v655_v5 = vld [vmem:[%s726_s1] sm:$0xff]  ;;  %v660_v6 = vld [vmem:[%s726_s1 + $0x8] sm:$0xff]  ;;  %v670_v8 = vld [vmem:[%s726_s1 + $0x18] sm:$0xff] }
   0xe   : > { %208 = vperm.xlu0 %550, %v204_v0   ;;  %s640_s22 = scalar_lea.vmem %s728_s3, %s506_s19  ;;  %v650_v4 = vand.u32 127, %v194_v3  ;;  %v675_v9 = vld [vmem:[%s726_s1 + $0x20] sm:$0xff]  ;;  %v680_v10 = vld [vmem:[%s726_s1 + $0x28] sm:$0xff] }
   0xf   : > { %s645_s25 = scalar_lea.vmem %s725_s0, %s514_s18 }
  0x16   : > { %213 = vperm.xlu0 %550, %v205_v2  }
  0x80   : > { %v682_v11 = vpop.permute.xlu0 %208 }
  0x88   : > { %v684_v12 = vpop.permute.xlu0 %213 }
  0x89 LB: >> { %s476_s17 = sshll.u32 %s591_s16, 2  ;;  %s594_s19 = smov 127   ;;  %vm509_vm0 = vcmp.ne.s32.totalorder %v650_v4, 127  ;;  %vm510_vm1 = vcmp.ne.s32.totalorder %v650_v4, 0  ;;  %vm234_vm2 = vcmask 195584   ;;  %s591_s16 = sphi %s686_s16, %s221_s16  }
  0x8a   : >> { %s225_s18 = scalar_lea.vmem %s645_s25, %s476_s17  ;;  %s595_s20 = smov 1  }
  0x8b   : >> { %v226_v13 = vld [vmem:[%s225_s18] sm:$0xff]   ;;  %v492_v14 = vld [vmem:[%s225_s18 + $0x8] sm:$0xf]  ;;  %s507_s21 = sshll.u32 %s591_s16, 3  ;;  %s221_s16 = sadd.s32 1, %s591_s16  }
  0x8c   : >> { %v227_v15 = vunpack.c.l.bf16 %v226_v13  ;;  %v312_v16 = vunpack.c.l.bf16 %v492_v14  ;;  %v270_v18 = vunpack.c.h.bf16 %v226_v13  ;;  %s355_s23 = scalar_lea.vmem %s640_s22, %s507_s21  ;;  %p218_p5 = scmp.ge.s32.totalorder %s221_s16, 64  }
  0x8e   : >> { %v551_v17 = vpack.i.bf16 %v227_v15, %v312_v16 }
  0x90   : >> { %552 = vrot.lane.b32.xlu0 %v551_v17, %s594_s19  ;;  %557 = vrot.lane.b32.xlu1 %v551_v17, %s595_s20 }
  0x98   : >> { %274 = vrot.lane.b32.xlu0 %v270_v18, %s594_s19  ;;  %271 = vrot.lane.b32.xlu1 %v270_v18, %s595_s20 }
 0x102   : >> { %v553_v19 = vpop.permute.xlu0 %552  ;;  %v558_v20 = vpop.permute.xlu1 %557 }
 0x103   : >> { %v555_v21 = vunpack.i.h.bf16 %v553_v19  ;;  %v554_v22 = vunpack.i.l.bf16 %v553_v19  ;;  %v560_v23 = vunpack.i.h.bf16 %v558_v20  ;;  %v559_v24 = vunpack.i.l.bf16 %v558_v20 }
 0x105   : >> { %478 = vmatpush.msk.msra.mxu0 %vm509_vm0, %v555_v21  ;;  %511 = vmatpush.msk.msra.mxu3 %vm509_vm0, %v555_v21 }
 0x106   : >> { %494 = vmatpush.msk.msra.mxu2 %vm509_vm0, %v554_v22 }
 0x107   : >> { %255 = vmatpush.msra.mxu0 %v227_v15  ;;  %512 = vmatpush.msra.mxu3 %v227_v15 }
 0x108   : >> { %339 = vmatpush.msra.mxu2 %v312_v16 }
 0x109   : >> { %480 = vmatpush.msk.msra.mxu0 %vm510_vm1, %v560_v23  ;;  %513 = vmatpush.msk.msra.mxu3 %vm510_vm1, %v560_v23 }
 0x10a   : >> { %496 = vmatpush.msk.msra.mxu2 %vm510_vm1, %v559_v24  ;;  %v275_v25 = vpop.permute.xlu0 %274  ;;  %481 = vmatmul.msk.f32.vlgmr.msra.gmra.mxu0 %vm234_vm2, %v655_v5  ;;  %v272_v26 = vpop.permute.xlu1 %271 }
 0x10b   : >> { %486 = vmatpush.msk.msra.mxu1 %vm509_vm0, %v275_v25  ;;  %497 = vmatmul.msk.f32.vlgmr.msra.gmra.mxu2 %vm234_vm2, %v675_v9 }
 0x10c   : >> { %482 = vmatmul.msk.f32.vlgmr.msra.gmra.mxu3 %vm234_vm2, %v660_v6 }
 0x10d   : >> { %297 = vmatpush.msra.mxu1 %v270_v18 }
 0x10f   : >> { %488 = vmatpush.msk.msra.mxu1 %vm510_vm1, %v272_v26 }
 0x110   : >> { %489 = vmatmul.msk.f32.vlgmr.msra.gmra.mxu1 %vm234_vm2, %v665_v7 }
 0x113   : >> { %498 = vmatmul.msk.f32.gmra.mxu2 %vm234_vm2, %v680_v10 }
 0x118   : >> { %490 = vmatmul.msk.f32.gmra.mxu1 %vm234_vm2, %v670_v8 }
 0x187   : >> { %v258_v27 = vpop.f32.mrf.mxu0 }
 0x188   : >> { %v264_v28 = vadd.f32 %v258_v27, %v682_v11 }
 0x18d   : >> { %v300_v29 = vpop.f32.mrf.mxu1 }
 0x18e   : >> { %v306_v30 = vadd.f32 %v300_v29, %v264_v28  ;;  %v342_v31 = vpop.f32.mrf.mxu2 }
 0x18f   : >> { %v261_v32 = vpop.f32.mrf.mxu3 }
 0x190   : >> { %v348_v33 = vadd.f32 %v342_v31, %v306_v30  ;;  %v265_v35 = vadd.f32 %v261_v32, %v684_v12 }
 0x192   : >> { %v350_v34 = vmax.f32 %v348_v33, 0.0 }
 0x194   : >> { %v352_v36 = vpack.c.bf16 %v350_v34, %v350_v34 }
 0x195   : >> { %v303_v37 = vpop.f32.mrf.mxu1 }
 0x196   : >> { %356 = vst [vmem:[%s355_s23] sm:$0xf] %v352_v36  ;;  %v307_v38 = vadd.f32 %v303_v37, %v265_v35  ;;  %v345_v39 = vpop.f32.mrf.mxu2 }
 0x198   : >> { %v349_v40 = vadd.f32 %v345_v39, %v307_v38 }
 0x19a   : >> { %v351_v41 = vmax.f32 %v349_v40, 0.0  ;;  %220 = sbr.rel (!%p218_p5) target bundleno = 137 (0x89), region = 74 }
 0x19c   : >> { %v357_v42 = vpack.c.bf16 %v351_v41, %v351_v41 }
 0x19e   : >> { %503 = vst [vmem:[%s355_s23 + $0x4] sm:$0xf] %v357_v42 }
 0x19f PF: > { %s13_s14 = sadd.s32 1, %s587_s14   ;;  %s729_s12 = smov %s583_s13 }
 0x1a0   : > { %p10_p6 = scmp.ge.s32.totalorder %s13_s14, 4   ;;  %s730_s13 = smov %s732_s15 }
 0x1a2   :  { %12 = sbr.rel (!%p10_p6) target bundleno = 2 (0x2), region = 85 }

// kernel: vitb16_head_forward.8
= control target key start
LH: loop header
LB: loop body
LE: loop exit
PB: predicated region body
PF: predicated region fallthrough
CT: control target
= control target key end

     0   :  { %s777_s12 = smov 0   ;;  %s779_s13 = smov 0   ;;  %s967_s0 = inlined_call_operand.vmem [shape: bf16[2,130,8,256], index: 0, kind: input, shape index: {}]   ;;  %s968_s1 = inlined_call_operand.vmem [shape: f32[3,16,24], index: 1, kind: input, shape index: {}]   ;;  %s969_s2 = inlined_call_operand.vmem [shape: f32[16,1], index: 2, kind: input, shape index: {}]   ;;  %s970_s3 = inlined_call_operand.vmem [shape: bf16[2,256,8,256], index: 3, kind: output, shape index: {}]  }
   0x1   :  { %s781_s14 = smov 0  }
   0x2 LB: > { %s25_s15 = sadd.s32 1, %s744_s13  ;;  %p600_p0 = scmp.ge.s32.totalorder %s748_s14, 1  ;;  %s748_s14 = sphi %s781_s14, %s13_s14   ;;  %s744_s13 = sphi %s779_s13, %s972_s13   ;;  %s740_s12 = sphi %s777_s12, %s971_s12  }
   0x3   : > { %p27_p1 = scmp.ge.s32.totalorder %s25_s15, 2  ;;  %p151_p2 = scmp.lt.s32.totalorder %s748_s14, 3 }
   0x5   : > { %s974_s15 = smov (%p27_p1, %s25_s15), 0  ;;  %p152_p3 = pnand %p600_p0, %p151_p2 }
   0x6   : > { %p180_p4 = scmp.lt.s32.totalorder (!%p152_p3), %s740_s12, 1  ;;  %s850_s16 = smov (!%p152_p3), 0  }
   0x7   : > { %155 = sbr.rel (%p152_p3) target bundleno = 429 (0x1ad), region = 32 }
   0xc   : > { %v209_v0 = vld [vmem:[%s969_s2] sm:$0xff]  ;;  %v754_v1 = vmov 0   ;;  %s976_s12 = smov (!%p180_p4, %s740_s12), 1  ;;  %v210_v2 = vld [vmem:[%s969_s2 + $0x8] sm:$0xff]  ;;  %v196_v3 = vlaneseq  ;;  %v829_v8 = vld [vmem:[%s968_s1 + $0x10] sm:$0xff] }
   0xd   : > { %691 = vset.pattern.permute.xlu0 %v754_v1  ;;  %s655_s18 = smul.u32 1040, %s976_s12  ;;  %s642_s19 = sshll.u32 %s976_s12, 11  ;;  %v819_v6 = vld [vmem:[%s968_s1] sm:$0xff]  ;;  %v824_v7 = vld [vmem:[%s968_s1 + $0x8] sm:$0xff]  ;;  %v834_v9 = vld [vmem:[%s968_s1 + $0x18] sm:$0xff] }
   0xe   : > { %213 = vperm.xlu0 %691, %v209_v0   ;;  %s801_s22 = scalar_lea.vmem %s970_s3, %s642_s19  ;;  %v811_v4 = vand.u32 127, %v196_v3  ;;  %v839_v10 = vld [vmem:[%s968_s1 + $0x20] sm:$0xff]  ;;  %v844_v11 = vld [vmem:[%s968_s1 + $0x28] sm:$0xff] }
   0xf   : > { %s806_s25 = scalar_lea.vmem %s967_s0, %s655_s18 }
  0x10   : > { %v814_v5 = vadd.s32 128, %v811_v4 }
  0x16   : > { %218 = vperm.xlu0 %691, %v210_v2  }
  0x80   : > { %v846_v12 = vpop.permute.xlu0 %213 }
  0x88   : > { %v848_v13 = vpop.permute.xlu0 %218 }
  0x89 LB: >> { %s643_s17 = sshll.u32 %s752_s16, 3  ;;  %s755_s19 = smov 127   ;;  %vm248_vm0 = vcmp.lt.s32.totalorder %v811_v4, 127  ;;  %vm648_vm1 = vcmp.ne.s32.totalorder %v814_v5, 255  ;;  %vm239_vm2 = vcmp.lt.s32.totalorder %v811_v4, 1  ;;  %vm647_vm3 = vcmp.ne.s32.totalorder %v811_v4, 0  ;;  %s752_s16 = sphi %s850_s16, %s226_s16  }
  0x8a   : >> { %s231_s18 = scalar_lea.vmem %s806_s25, %s643_s17  ;;  %s756_s20 = smov 1   ;;  %vm253_vm4 = vcmask 195584  }
  0x8b   : >> { %v232_v14 = vld [vmem:[%s231_s18] sm:$0xff]  ;;  %v857_v15 = vld [vmem:[%s231_s18 + $0x8] sm:$0xff]  ;;  %v859_v16 = vld [vmem:[%s231_s18 + $0x10] sm:$0xff]  ;;  %s645_s21 = sshll.u32 %s752_s16, 4  ;;  %s226_s16 = sadd.s32 1, %s752_s16  }
  0x8c   : >> { %v233_v17 = vunpack.c.l.bf16 %v232_v14  ;;  %v234_v18 = vunpack.c.h.bf16 %v232_v14  ;;  %v315_v19 = vunpack.c.l.bf16 %v857_v15  ;;  %v316_v20 = vunpack.c.h.bf16 %v857_v15  ;;  %s476_s23 = scalar_lea.vmem %s801_s22, %s645_s21  ;;  %p223_p5 = scmp.ge.s32.totalorder %s226_s16, 128  }
  0x8d   : >> { %v394_v21 = vunpack.c.l.bf16 %v859_v16  ;;  %v395_v22 = vunpack.c.h.bf16 %v859_v16 }
  0x8e   : >> { %v692_v23 = vpack.i.bf16 %v234_v18, %v233_v17  ;;  %v702_v24 = vpack.i.bf16 %v316_v20, %v315_v19 }
  0x8f   : >> { %v712_v25 = vpack.i.bf16 %v395_v22, %v394_v21 }
  0x90   : >> { %693 = vrot.lane.b32.xlu0 %v692_v23, %s755_s19  ;;  %703 = vrot.lane.b32.xlu1 %v702_v24, %s755_s19 }
  0x91   : >> { %713 = vrot.lane.b32.xlu2 %v712_v25, %s755_s19 }
  0x98   : >> { %698 = vrot.lane.b32.xlu0 %v692_v23, %s756_s20  ;;  %708 = vrot.lane.b32.xlu1 %v702_v24, %s756_s20 }
  0x99   : >> { %718 = vrot.lane.b32.xlu2 %v712_v25, %s756_s20 }
  0xeb   : >> { %v714_v32 = vpop.permute.xlu2 %713 }
  0xec   : >> { %v716_v38 = vunpack.i.h.bf16 %v714_v32  ;;  %v715_v39 = vunpack.i.l.bf16 %v714_v32 }
  0xee   : >> { %v408_v47 = vsel %vm248_vm0, %v715_v39, %v716_v38  ;;  %v409_v48 = vsel %vm248_vm0, %v716_v38, %v715_v39 }
  0xf3   : >> { %v719_v49 = vpop.permute.xlu2 %718 }
  0xf4   : >> { %v721_v52 = vunpack.i.h.bf16 %v719_v49  ;;  %v720_v53 = vunpack.i.l.bf16 %v719_v49 }
  0xf6   : >> { %v401_v54 = vsel %vm239_vm2, %v721_v52, %v720_v53  ;;  %v400_v55 = vsel %vm239_vm2, %v720_v53, %v721_v52 }
 0x102   : >> { %v694_v26 = vpop.permute.xlu0 %693  ;;  %v704_v27 = vpop.permute.xlu1 %703 }
 0x103   : >> { %v696_v28 = vunpack.i.h.bf16 %v694_v26  ;;  %v695_v29 = vunpack.i.l.bf16 %v694_v26  ;;  %v706_v33 = vunpack.i.h.bf16 %v704_v27  ;;  %v705_v34 = vunpack.i.l.bf16 %v704_v27 }
 0x105   : >> { %v249_v30 = vsel %vm248_vm0, %v695_v29, %v696_v28  ;;  %v250_v31 = vsel %vm248_vm0, %v696_v28, %v695_v29  ;;  %v329_v43 = vsel %vm248_vm0, %v705_v34, %v706_v33  ;;  %v330_v44 = vsel %vm248_vm0, %v706_v33, %v705_v34 }
 0x106   : >> { %273 = vmatpush.msra.mxu0 %v249_v30  ;;  %649 = vmatpush.msra.mxu2 %v249_v30 }
 0x107   : >> { %611 = vmatpush.msk.msra.mxu1 %vm648_vm1, %v250_v31  ;;  %652 = vmatpush.msk.msra.mxu3 %vm648_vm1, %v250_v31 }
 0x108   : >> { %274 = vmatpush.msra.mxu0 %v233_v17  ;;  %650 = vmatpush.msra.mxu2 %v233_v17 }
 0x109   : >> { %297 = vmatpush.msra.mxu1 %v234_v18  ;;  %653 = vmatpush.msra.mxu3 %v234_v18 }
 0x10a   : >> { %v699_v35 = vpop.permute.xlu0 %698  ;;  %v709_v40 = vpop.permute.xlu1 %708 }
 0x10b   : >> { %v701_v36 = vunpack.i.h.bf16 %v699_v35  ;;  %v700_v37 = vunpack.i.l.bf16 %v699_v35  ;;  %v711_v45 = vunpack.i.h.bf16 %v709_v40  ;;  %v710_v46 = vunpack.i.l.bf16 %v709_v40 }
 0x10d   : >> { %v241_v41 = vsel %vm239_vm2, %v701_v36, %v700_v37  ;;  %v240_v42 = vsel %vm239_vm2, %v700_v37, %v701_v36  ;;  %v322_v50 = vsel %vm239_vm2, %v711_v45, %v710_v46  ;;  %v321_v51 = vsel %vm239_vm2, %v710_v46, %v711_v45 }
 0x10e   : >> { %607 = vmatpush.msk.msra.mxu0 %vm647_vm3, %v241_v41  ;;  %651 = vmatpush.msk.msra.mxu2 %vm647_vm3, %v241_v41 }
 0x10f   : >> { %298 = vmatpush.msra.mxu1 %v240_v42  ;;  %654 = vmatpush.msra.mxu3 %v240_v42 }
 0x110   : >> { %609 = vmatmul.msk.f32.vlgmr.msra.gmra.mxu2 %vm253_vm4, %v824_v7  ;;  %613 = vmatmul.msk.f32.vlgmr.msra.gmra.mxu3 %vm253_vm4, %v824_v7 }
 0x111   : >> { %352 = vmatpush.msrb.mxu2 %v329_v43  ;;  %621 = vmatpush.msk.msrb.mxu3 %vm648_vm1, %v330_v44 }
 0x112   : >> { %431 = vmatpush.msrb.mxu0 %v408_v47  ;;  %631 = vmatpush.msk.msrb.mxu1 %vm648_vm1, %v409_v48 }
 0x113   : >> { %353 = vmatpush.msrb.mxu2 %v315_v19  ;;  %376 = vmatpush.msrb.mxu3 %v316_v20 }
 0x114   : >> { %608 = vmatmul.msk.f32.vlgmr.msra.gmra.mxu0 %vm253_vm4, %v819_v6  ;;  %612 = vmatmul.msk.f32.vlgmr.msra.gmra.mxu1 %vm253_vm4, %v819_v6 }
 0x115   : >> { %617 = vmatpush.msk.msrb.mxu2 %vm647_vm3, %v322_v50  ;;  %377 = vmatpush.msrb.mxu3 %v321_v51 }
 0x116   : >> { %432 = vmatpush.msrb.mxu0 %v394_v21  ;;  %455 = vmatpush.msrb.mxu1 %v395_v22 }
 0x118   : >> { %618 = vmatmul.msk.f32.vlgmr.msrb.gmra.mxu2 %vm253_vm4, %v829_v8  ;;  %622 = vmatmul.msk.f32.vlgmr.msrb.gmra.mxu3 %vm253_vm4, %v829_v8 }
 0x119   : >> { %627 = vmatpush.msk.msrb.mxu0 %vm647_vm3, %v401_v54  ;;  %456 = vmatpush.msrb.mxu1 %v400_v55 }
 0x11c   : >> { %628 = vmatmul.msk.f32.vlgmr.msrb.gmra.mxu0 %vm253_vm4, %v839_v10  ;;  %632 = vmatmul.msk.f32.vlgmr.msrb.gmra.mxu1 %vm253_vm4, %v839_v10 }
 0x120   : >> { %619 = vmatmul.msk.f32.gmra.mxu2 %vm253_vm4, %v834_v9  ;;  %623 = vmatmul.msk.f32.gmra.mxu3 %vm253_vm4, %v834_v9 }
 0x124   : >> { %629 = vmatmul.msk.f32.gmra.mxu0 %vm253_vm4, %v844_v11  ;;  %633 = vmatmul.msk.f32.gmra.mxu1 %vm253_vm4, %v844_v11 }
 0x191   : >> { %v277_v56 = vpop.f32.mrf.mxu0  ;;  %v300_v57 = vpop.f32.mrf.mxu1 }
 0x192   : >> { %v306_v62 = vadd.f32 %v277_v56, %v846_v12  ;;  %v307_v63 = vadd.f32 %v300_v57, %v846_v12 }
 0x193   : >> { %v280_v58 = vpop.f32.mrf.mxu2  ;;  %v303_v59 = vpop.f32.mrf.mxu3 }
 0x194   : >> { %v308_v18 = vadd.f32 %v280_v58, %v848_v13  ;;  %v309_v19 = vadd.f32 %v303_v59, %v848_v13 }
 0x199   : >> { %v435_v60 = vpop.f32.mrf.mxu0  ;;  %v458_v61 = vpop.f32.mrf.mxu1 }
 0x19b   : >> { %v356_v0 = vpop.f32.mrf.mxu2  ;;  %v379_v1 = vpop.f32.mrf.mxu3 }
 0x19c   : >> { %v385_v2 = vadd.f32 %v356_v0, %v306_v62  ;;  %v386_v3 = vadd.f32 %v379_v1, %v307_v63 }
 0x19e   : >> { %v464_v14 = vadd.f32 %v435_v60, %v385_v2  ;;  %v465_v15 = vadd.f32 %v458_v61, %v386_v3 }
 0x1a0   : >> { %v468_v16 = vmax.f32 %v464_v14, 0.0  ;;  %v469_v17 = vmax.f32 %v465_v15, 0.0 }
 0x1a1   : >> { %v438_v21 = vpop.f32.mrf.mxu0  ;;  %v461_v22 = vpop.f32.mrf.mxu1 }
 0x1a2   : >> { %v472_v20 = vpack.c.bf16 %v469_v17, %v468_v16 }
 0x1a3   : >> { %v359_v23 = vpop.f32.mrf.mxu2  ;;  %v382_v24 = vpop.f32.mrf.mxu3 }
 0x1a4   : >> { %477 = vst [vmem:[%s476_s23] sm:$0xff] %v472_v20  ;;  %v387_v25 = vadd.f32 %v359_v23, %v308_v18  ;;  %v388_v26 = vadd.f32 %v382_v24, %v309_v19 }
 0x1a6   : >> { %v466_v27 = vadd.f32 %v438_v21, %v387_v25  ;;  %v467_v28 = vadd.f32 %v461_v22, %v388_v26 }
 0x1a8   : >> { %v470_v29 = vmax.f32 %v466_v27, 0.0  ;;  %v471_v30 = vmax.f32 %v467_v28, 0.0  ;;  %225 = sbr.rel (!%p223_p5) target bundleno = 137 (0x89), region = 74 }
 0x1aa   : >> { %v478_v31 = vpack.c.bf16 %v471_v30, %v470_v29 }
 0x1ac   : >> { %639 = vst [vmem:[%s476_s23 + $0x8] sm:$0xff] %v478_v31 }
 0x1ad PF: > { %s13_s14 = sadd.s32 1, %s748_s14   ;;  %s971_s12 = smov %s744_s13 }
 0x1ae   : > { %p10_p6 = scmp.ge.s32.totalorder %s13_s14, 4   ;;  %s972_s13 = smov %s974_s15 }
 0x1b0   :  { %12 = sbr.rel (!%p10_p6) target bundleno = 2 (0x2), region = 85 }

// kernel: vitb16_head_forward.9
= control target key start
LH: loop header
LB: loop body
LE: loop exit
PB: predicated region body
PF: predicated region fallthrough
CT: control target
= control target key end

     0   :  { %s1328_s18 = smov 0   ;;  %s1330_s19 = smov 0   ;;  %s1671_s0 = inlined_call_operand.vmem [shape: bf16[2,258,8,512], index: 0, kind: input, shape index: {}]   ;;  %s1672_s1 = inlined_call_operand.vmem [shape: f32[3,16,24], index: 1, kind: input, shape index: {}]   ;;  %s1673_s2 = inlined_call_operand.vmem [shape: f32[16,1], index: 2, kind: input, shape index: {}]   ;;  %s1674_s3 = inlined_call_operand.vmem [shape: f32[2,8], index: 3, kind: input, shape index: {}]   ;;  %s1675_s4 = inlined_call_operand.vmem [shape: f32[2,1], index: 4, kind: input, shape index: {}]   ;;  %s1676_s5 = inlined_call_operand.vmem [shape: f32[2,512,2,512], index: 5, kind: output, shape index: {}]  }
   0x1   :  { %s1332_s20 = smov 0   ;;  %s1334_s21 = smov 0  }
   0x2   :  { %s1336_s22 = smov 0  }
   0x3 LB: > { %s24_s23 = sadd.s32 1, %s1281_s20  ;;  %s27_s24 = sadd.s32 1, %s1285_s21  ;;  %s1289_s22 = sphi %s1336_s22, %s15_s22   ;;  %s1285_s21 = sphi %s1334_s21, %s1680_s21   ;;  %s1281_s20 = sphi %s1332_s20, %s1679_s20   ;;  %s1277_s19 = sphi %s1330_s19, %s1678_s19   ;;  %s1273_s18 = sphi %s1328_s18, %s1677_s18  }
   0x4   : > { %p25_p0 = scmp.ge.s32.totalorder %s24_s23, 2  ;;  %p1068_p1 = scmp.ge.s32.totalorder %s1289_s22, 1 }
   0x5   : > { %p201_p2 = scmp.lt.s32.totalorder %s1289_s22, 5 }
   0x6   : > { %s1682_s23 = smov (%p25_p0, %s24_s23), 0  ;;  %s1684_s24 = smov (!%p25_p0, %s27_s24), %s1285_s21 }
   0x7   : > { %p202_p3 = pnand %p1068_p1, %p201_p2  ;;  %p29_p4 = scmp.ge.s32.totalorder %s1684_s24, 2 }
   0x8   : > { %p234_p5 = scmp.lt.s32.totalorder (!%p202_p3), %s1277_s19, 1  ;;  %s1070_s29 = sshll.u32 (!%p202_p3), %s1273_s18, 8 }
   0x9   : > { %s1686_s24 = smov (%p29_p4, %s1684_s24), 0  ;;  %205 = sbr.rel (%p202_p3) target bundleno = 598 (0x256), region = 40 }
   0xa   : > { %p242_p6 = scmp.lt.s32.totalorder (!%p202_p3), %s1070_s29, 511 }
   0xe   : > { %v269_v0 = vld [vmem:[%s1673_s2] sm:$0xff]  ;;  %v1295_v2 = vmov 0   ;;  %s1688_s19 = smov (!%p234_p5, %s1277_s19), 1  ;;  %s1690_s29 = smov (!%p242_p6, %s1070_s29), 511  ;;  %v270_v3 = vld [vmem:[%s1673_s2 + $0x8] sm:$0xff]  ;;  %v250_v4 = vlaneseq  ;;  %v1398_v9 = vld [vmem:[%s1672_s1 + $0x10] sm:$0xff] }
   0xf   : > { %v282_v1 = vld [vmem:[%s1675_s4] sm:$0x3]  ;;  %1195 = vset.pattern.permute.xlu0 %v1295_v2  ;;  %1196 = vset.pattern.permute.xlu1 %v1295_v2  ;;  %s1143_s30 = smul.u32 4128, %s1688_s19  ;;  %s1072_s6 = sshll.u32 %s1688_s19, 11  ;;  %v1393_v8 = vld [vmem:[%s1672_s1 + $0x8] sm:$0xff]  ;;  %v1403_v10 = vld [vmem:[%s1672_s1 + $0x18] sm:$0xff] }
  0x10   : > { %273 = vperm.xlu0 %1195, %v269_v0   ;;  %285 = vperm.xlu1 %1196, %v282_v1   ;;  %s1071_s12 = sshll.u32 %s1690_s29, 2  ;;  %v1380_v5 = vand.u32 127, %v250_v4  ;;  %v1388_v7 = vld [vmem:[%s1672_s1] sm:$0xff]  ;;  %v1413_v12 = vld [vmem:[%s1672_s1 + $0x28] sm:$0xff] }
  0x11   : > { %s1370_s9 = scalar_lea.vmem %s1671_s0, %s1143_s30  ;;  %s246_s13 = sadd.s32 %s1072_s6, %s1071_s12  ;;  %v1408_v11 = vld [vmem:[%s1672_s1 + $0x20] sm:$0xff] }
  0x12   : > { %s1073_s14 = sshll.u32 %s246_s13, 1  ;;  %v1383_v6 = vadd.s32 384, %v1380_v5  ;;  %v1418_v13 = vld [vmem:[%s1674_s3] sm:$0x3] }
  0x13   : > { %s1378_s17 = scalar_lea.vmem %s1676_s5, %s1073_s14  ;;  %s1426_s14 = smov 0  }
  0x18   : > { %278 = vperm.xlu0 %1195, %v270_v3  }
  0x82   : > { %v1420_v14 = vpop.permute.xlu0 %273  ;;  %v1422_v15 = vpop.permute.xlu1 %285 }
  0x8a   : > { %v1424_v16 = vpop.permute.xlu0 %278 }
  0x8b LB: >> { %s1074_s15 = sshll.u32 %s1273_s18, 7  ;;  %s1296_s26 = smov 1   ;;  %vm330_vm0 = vcmp.lt.s32.totalorder %v1380_v5, 127  ;;  %vm1142_vm1 = vcmp.ne.s32.totalorder %v1383_v6, 511  ;;  %vm313_vm2 = vcmp.lt.s32.totalorder %v1380_v5, 1  ;;  %vm1141_vm3 = vcmp.ne.s32.totalorder %v1380_v5, 0  ;;  %s1293_s14 = sphi %s1426_s14, %s293_s14  }
  0x8c   : >> { %s295_s16 = sadd.s32 %s1293_s14, %s1074_s15  ;;  %s1297_s27 = smov 127   ;;  %vm339_vm4 = vcmask 195584   ;;  %vm750_vm5 = vcmask 64512   ;;  %vm922_vm6 = vcmask 1041408   ;;  %vm924_vm7 = vcmask 1045508  }
  0x8d   : >> { %s1137_s19 = sshll.u32 %s295_s16, 4  ;;  %s1139_s28 = sshll.u32 %s1293_s14, 4  ;;  %vm926_vm8 = vcmask 1043456  }
  0x8e   : >> { %s298_s25 = scalar_lea.vmem %s1370_s9, %s1137_s19  ;;  %s931_s29 = scalar_lea.vmem %s1378_s17, %s1139_s28 }
  0x8f   : >> { %v299_v17 = vld [vmem:[%s298_s25] sm:$0xff]  ;;  %v300_v18 = vld [vmem:[%s298_s25 + $0x8] sm:$0xff]  ;;  %v1091_v22 = vld [vmem:[%s298_s25 + $0x10] sm:$0xff]  ;;  %s293_s14 = sadd.s32 1, %s1293_s14  }
  0x90   : >> { %v1434_v19 = vunpack.c.h.bf16 %v299_v17  ;;  %v1436_v20 = vunpack.c.l.bf16 %v300_v18  ;;  %v1438_v21 = vunpack.c.l.bf16 %v299_v17  ;;  %v1092_v23 = vld [vmem:[%s298_s25 + $0x18] sm:$0xff]  ;;  %v1442_v25 = vunpack.c.l.bf16 %v1091_v22  ;;  %v1108_v35 = vld [vmem:[%s298_s25 + $0x28] sm:$0xff]  ;;  %v1107_v36 = vld [vmem:[%s298_s25 + $0x20] sm:$0xff]  ;;  %p290_p7 = scmp.ge.s32.totalorder %s293_s14, 128  }
  0x91   : >> { %v1440_v24 = vunpack.c.l.bf16 %v1092_v23  ;;  %v1450_v29 = vunpack.c.h.bf16 %v300_v18  ;;  %v1453_v30 = vunpack.c.h.bf16 %v1091_v22  ;;  %v1455_v31 = vunpack.c.h.bf16 %v1092_v23 }
  0x92   : >> { %v1207_v26 = vpack.i.bf16 %v1436_v20, %v1434_v19  ;;  %v1197_v27 = vpack.i.bf16 %v1436_v20, %v1438_v21  ;;  %v1464_v37 = vunpack.c.l.bf16 %v1108_v35  ;;  %v1466_v38 = vunpack.c.l.bf16 %v1107_v36 }
  0x93   : >> { %v1217_v28 = vpack.i.bf16 %v1440_v24, %v1442_v25  ;;  %v1212_v32 = vpack.i.bf16 %v1438_v21, %v1450_v29  ;;  %v1202_v33 = vpack.i.bf16 %v1434_v19, %v1450_v29  ;;  %v1222_v34 = vpack.i.bf16 %v1453_v30, %v1455_v31 }
  0x94   : >> { %1208 = vrot.lane.b32.xlu1 %v1207_v26, %s1296_s26  ;;  %1198 = vrot.lane.b32.xlu0 %v1197_v27, %s1297_s27  ;;  %v1227_v39 = vpack.i.bf16 %v1440_v24, %v1453_v30  ;;  %v1232_v40 = vpack.i.bf16 %v1442_v25, %v1455_v31  ;;  %v1237_v41 = vpack.i.bf16 %v1464_v37, %v1466_v38  ;;  %v1476_v42 = vunpack.c.h.bf16 %v1107_v36 }
  0x95   : >> { %1218 = vrot.lane.b32.xlu2 %v1217_v28, %s1297_s27  ;;  %v1478_v43 = vunpack.c.h.bf16 %v1108_v35 }
  0x96   : >> { %v1242_v44 = vpack.i.bf16 %v1464_v37, %v1476_v42 }
  0x9c   : >> { %1213 = vrot.lane.b32.xlu1 %v1212_v32, %s1296_s26  ;;  %1203 = vrot.lane.b32.xlu0 %v1202_v33, %s1297_s27 }
  0x9d   : >> { %1223 = vrot.lane.b32.xlu2 %v1222_v34, %s1297_s27 }
  0xa4   : >> { %1228 = vrot.lane.b32.xlu0 %v1227_v39, %s1296_s26  ;;  %1233 = vrot.lane.b32.xlu1 %v1232_v40, %s1296_s26 }
  0xa5   : >> { %1238 = vrot.lane.b32.xlu2 %v1237_v41, %s1297_s27 }
  0xac   : >> { %626 = vrot.lane.b32.xlu0 %v1478_v43, %s1297_s27  ;;  %1243 = vrot.lane.b32.xlu1 %v1242_v44, %s1296_s26 }
  0xad   : >> { %610 = vrot.lane.b32.xlu2 %v1478_v43, %s1296_s26 }
  0xb4   : >> { %622 = vrot.lane.b32.xlu0 %v1476_v42, %s1297_s27  ;;  %604 = vrot.lane.b32.xlu1 %v1466_v38, %s1296_s26 }
  0xef   : >> { %v1219_v45 = vpop.permute.xlu2 %1218 }
  0xf0   : >> { %v1220_v63 = vunpack.i.l.bf16 %v1219_v45  ;;  %v1221_v1 = vunpack.i.h.bf16 %v1219_v45 }
  0xf7   : >> { %v1224_v48 = vpop.permute.xlu2 %1223 }
  0xf8   : >> { %v1226_v0 = vunpack.i.h.bf16 %v1224_v48  ;;  %v1225_v3 = vunpack.i.l.bf16 %v1224_v48 }
  0xfa   : >> { %v481_v23 = vsel %vm330_vm0, %v1226_v0, %v1221_v1  ;;  %v483_v32 = vsel %vm330_vm0, %v1225_v3, %v1220_v63 }
  0xff   : >> { %v1239_v17 = vpop.permute.xlu2 %1238 }
 0x100   : >> { %v1241_v36 = vunpack.i.h.bf16 %v1239_v17  ;;  %v1240_v39 = vunpack.i.l.bf16 %v1239_v17 }
 0x106   : >> { %v1209_v46 = vpop.permute.xlu1 %1208  ;;  %v1199_v47 = vpop.permute.xlu0 %1198 }
 0x107   : >> { %v1201_v51 = vunpack.i.h.bf16 %v1199_v47  ;;  %v1200_v52 = vunpack.i.l.bf16 %v1199_v47  ;;  %v1211_v61 = vunpack.i.h.bf16 %v1209_v46  ;;  %v1210_v62 = vunpack.i.l.bf16 %v1209_v46 }
 0x109   : >> { %v315_v18 = vsel %vm313_vm2, %v1210_v62, %v1211_v61 }
 0x10e   : >> { %v1214_v49 = vpop.permute.xlu1 %1213  ;;  %v1204_v50 = vpop.permute.xlu0 %1203 }
 0x10f   : >> { %v1206_v53 = vunpack.i.h.bf16 %v1204_v50  ;;  %v1205_v54 = vunpack.i.l.bf16 %v1204_v50  ;;  %v1216_v55 = vunpack.i.h.bf16 %v1214_v49  ;;  %v1215_v56 = vunpack.i.l.bf16 %v1214_v49 }
 0x111   : >> { %v333_v57 = vsel %vm330_vm0, %v1200_v52, %v1206_v53  ;;  %v332_v58 = vsel %vm330_vm0, %v1206_v53, %v1201_v51  ;;  %v331_v59 = vsel %vm330_vm0, %v1201_v51, %v1205_v54  ;;  %v334_v60 = vsel %vm330_vm0, %v1205_v54, %v1200_v52 }
 0x112   : >> { %359 = vmatpush.msra.mxu0 %v333_v57  ;;  %382 = vmatpush.msra.mxu1 %v332_v58  ;;  %v317_v2 = vsel %vm313_vm2, %v1215_v56, %v1216_v55  ;;  %v316_v4 = vsel %vm313_vm2, %v1216_v55, %v1210_v62 }
 0x113   : >> { %405 = vmatpush.msra.mxu2 %v331_v59  ;;  %1086 = vmatpush.msk.msra.mxu3 %vm1142_vm1, %v334_v60 }
 0x114   : >> { %360 = vmatpush.msra.mxu0 %v1438_v21  ;;  %383 = vmatpush.msra.mxu1 %v1434_v19  ;;  %v314_v19 = vsel %vm313_vm2, %v1211_v61, %v1215_v56 }
 0x115   : >> { %406 = vmatpush.msra.mxu2 %v1436_v20  ;;  %429 = vmatpush.msra.mxu3 %v1450_v29  ;;  %v482_v20 = vsel %vm330_vm0, %v1220_v63, %v1226_v0  ;;  %v480_v29 = vsel %vm330_vm0, %v1221_v1, %v1225_v3 }
 0x116   : >> { %1078 = vmatpush.msk.msra.mxu0 %vm1141_vm3, %v317_v2  ;;  %384 = vmatpush.msra.mxu1 %v316_v4  ;;  %v1229_v21 = vpop.permute.xlu0 %1228  ;;  %v1234_v22 = vpop.permute.xlu1 %1233 }
 0x117   : >> { %407 = vmatpush.msra.mxu2 %v315_v18  ;;  %430 = vmatpush.msra.mxu3 %v314_v19  ;;  %v1230_v26 = vunpack.i.l.bf16 %v1229_v21  ;;  %v1236_v27 = vunpack.i.h.bf16 %v1234_v22  ;;  %v1235_v28 = vunpack.i.l.bf16 %v1234_v22  ;;  %v1231_v33 = vunpack.i.h.bf16 %v1229_v21 }
 0x118   : >> { %1079 = vmatmul.msk.f32.vlgmr.msra.gmra.mxu0 %vm339_vm4, %v1388_v7  ;;  %1081 = vmatmul.msk.f32.vlgmr.msra.gmra.mxu1 %vm339_vm4, %v1388_v7 }
 0x119   : >> { %1083 = vmatmul.msk.f32.vlgmr.msra.gmra.mxu2 %vm339_vm4, %v1388_v7  ;;  %1087 = vmatmul.msk.f32.vlgmr.msra.gmra.mxu3 %vm339_vm4, %v1388_v7  ;;  %v467_v34 = vsel %vm313_vm2, %v1235_v28, %v1236_v27  ;;  %v466_v35 = vsel %vm313_vm2, %v1236_v27, %v1230_v26  ;;  %v465_v40 = vsel %vm313_vm2, %v1230_v26, %v1231_v33 }
 0x11a   : >> { %507 = vmatpush.msrb.mxu0 %v482_v20  ;;  %530 = vmatpush.msrb.mxu1 %v481_v23  ;;  %v464_v41 = vsel %vm313_vm2, %v1231_v33, %v1235_v28 }
 0x11b   : >> { %553 = vmatpush.msrb.mxu2 %v480_v29  ;;  %1102 = vmatpush.msk.msrb.mxu3 %vm1142_vm1, %v483_v32 }
 0x11c   : >> { %508 = vmatpush.msrb.mxu0 %v1442_v25  ;;  %531 = vmatpush.msrb.mxu1 %v1453_v30 }
 0x11d   : >> { %554 = vmatpush.msrb.mxu2 %v1440_v24  ;;  %577 = vmatpush.msrb.mxu3 %v1455_v31  ;;  %v611_v24 = vpop.permute.xlu2 %610 }
 0x11e   : >> { %v627_v44 = vpop.permute.xlu0 %626  ;;  %1094 = vmatpush.msk.msrb.mxu0 %vm1141_vm3, %v467_v34  ;;  %532 = vmatpush.msrb.mxu1 %v466_v35  ;;  %v1244_v45 = vpop.permute.xlu1 %1243 }
 0x11f   : >> { %555 = vmatpush.msrb.mxu2 %v465_v40  ;;  %578 = vmatpush.msrb.mxu3 %v464_v41  ;;  %v1246_v25 = vunpack.i.h.bf16 %v1244_v45  ;;  %v1245_v30 = vunpack.i.l.bf16 %v1244_v45  ;;  %v628_v46 = vsel %vm330_vm0, %v1241_v36, %v627_v44  ;;  %v631_v47 = vsel %vm330_vm0, %v627_v44, %v1240_v39 }
 0x120   : >> { %1080 = vmatmul.msk.f32.gmra.mxu0 %vm339_vm4, %v1393_v8  ;;  %1082 = vmatmul.msk.f32.gmra.mxu1 %vm339_vm4, %v1393_v8 }
 0x121   : >> { %1084 = vmatmul.msk.f32.gmra.mxu2 %vm339_vm4, %v1393_v8  ;;  %1088 = vmatmul.msk.f32.gmra.mxu3 %vm339_vm4, %v1393_v8  ;;  %v613_v31 = vsel %vm313_vm2, %v1245_v30, %v1246_v25  ;;  %v612_v48 = vsel %vm313_vm2, %v1246_v25, %v611_v24 }
 0x122   : >> { %701 = vmatpush.msra.mxu2 %v628_v46  ;;  %1118 = vmatpush.msk.msra.mxu3 %vm1142_vm1, %v631_v47 }
 0x124   : >> { %702 = vmatpush.msra.mxu2 %v1464_v37  ;;  %725 = vmatpush.msra.mxu3 %v1478_v43 }
 0x126   : >> { %v623_v49 = vpop.permute.xlu0 %622  ;;  %703 = vmatpush.msra.mxu2 %v613_v31  ;;  %726 = vmatpush.msra.mxu3 %v612_v48  ;;  %v605_v52 = vpop.permute.xlu1 %604 }
 0x127   : >> { %v629_v50 = vsel %vm330_vm0, %v623_v49, %v1241_v36  ;;  %v630_v51 = vsel %vm330_vm0, %v1240_v39, %v623_v49  ;;  %v615_v37 = vsel %vm313_vm2, %v611_v24, %v605_v52  ;;  %v614_v43 = vsel %vm313_vm2, %v605_v52, %v1245_v30 }
 0x128   : >> { %1095 = vmatmul.msk.f32.vlgmr.msrb.gmra.mxu0 %vm339_vm4, %v1398_v9  ;;  %1097 = vmatmul.msk.f32.vlgmr.msrb.gmra.mxu1 %vm339_vm4, %v1398_v9 }
 0x129   : >> { %1099 = vmatmul.msk.f32.vlgmr.msrb.gmra.mxu2 %vm339_vm4, %v1398_v9  ;;  %1103 = vmatmul.msk.f32.vlgmr.msrb.gmra.mxu3 %vm339_vm4, %v1398_v9 }
 0x12a   : >> { %655 = vmatpush.msra.mxu0 %v630_v51  ;;  %678 = vmatpush.msra.mxu1 %v629_v50 }
 0x12c   : >> { %656 = vmatpush.msra.mxu0 %v1466_v38  ;;  %679 = vmatpush.msra.mxu1 %v1476_v42 }
 0x12e   : >> { %1110 = vmatpush.msk.msra.mxu0 %vm1141_vm3, %v615_v37  ;;  %680 = vmatpush.msra.mxu1 %v614_v43 }
 0x130   : >> { %1096 = vmatmul.msk.f32.gmra.mxu0 %vm339_vm4, %v1403_v10  ;;  %1098 = vmatmul.msk.f32.gmra.mxu1 %vm339_vm4, %v1403_v10 }
 0x131   : >> { %1100 = vmatmul.msk.f32.gmra.mxu2 %vm339_vm4, %v1403_v10  ;;  %1104 = vmatmul.msk.f32.gmra.mxu3 %vm339_vm4, %v1403_v10 }
 0x138   : >> { %1111 = vmatmul.msk.f32.vlgmr.msra.gmra.mxu0 %vm339_vm4, %v1408_v11  ;;  %1113 = vmatmul.msk.f32.vlgmr.msra.gmra.mxu1 %vm339_vm4, %v1408_v11 }
 0x139   : >> { %1115 = vmatmul.msk.f32.vlgmr.msra.gmra.mxu2 %vm339_vm4, %v1408_v11  ;;  %1119 = vmatmul.msk.f32.vlgmr.msra.gmra.mxu3 %vm339_vm4, %v1408_v11 }
 0x140   : >> { %1112 = vmatmul.msk.f32.gmra.mxu0 %vm339_vm4, %v1413_v12  ;;  %1114 = vmatmul.msk.f32.gmra.mxu1 %vm339_vm4, %v1413_v12 }
 0x141   : >> { %1116 = vmatmul.msk.f32.gmra.mxu2 %vm339_vm4, %v1413_v12  ;;  %1120 = vmatmul.msk.f32.gmra.mxu3 %vm339_vm4, %v1413_v12 }
 0x195   : >> { %v363_v38 = vpop.f32.mrf.mxu0  ;;  %v386_v42 = vpop.f32.mrf.mxu1 }
 0x196   : >> { %v438_v1 = vadd.f32 %v363_v38, %v1420_v14  ;;  %v439_v2 = vadd.f32 %v386_v42, %v1420_v14 }
 0x19c   : >> { %v409_v53 = vpop.f32.mrf.mxu2  ;;  %v432_v54 = vpop.f32.mrf.mxu3 }
 0x19d   : >> { %v366_v55 = vpop.f32.mrf.mxu0  ;;  %v389_v56 = vpop.f32.mrf.mxu1  ;;  %v440_v28 = vadd.f32 %v409_v53, %v1420_v14  ;;  %v441_v29 = vadd.f32 %v432_v54, %v1420_v14 }
 0x19e   : >> { %v442_v23 = vadd.f32 %v366_v55, %v1424_v16  ;;  %v443_v32 = vadd.f32 %v389_v56, %v1424_v16 }
 0x1a4   : >> { %v412_v57 = vpop.f32.mrf.mxu2  ;;  %v435_v58 = vpop.f32.mrf.mxu3 }
 0x1a5   : >> { %v511_v59 = vpop.f32.mrf.mxu0  ;;  %v534_v60 = vpop.f32.mrf.mxu1  ;;  %v444_v49 = vadd.f32 %v412_v57, %v1424_v16  ;;  %v445_v50 = vadd.f32 %v435_v58, %v1424_v16 }
 0x1a6   : >> { %v586_v3 = vadd.f32 %v511_v59, %v438_v1  ;;  %v587_v4 = vadd.f32 %v534_v60, %v439_v2 }
 0x1ac   : >> { %v557_v61 = vpop.f32.mrf.mxu2  ;;  %v580_v62 = vpop.f32.mrf.mxu3 }
 0x1ad   : >> { %v514_v63 = vpop.f32.mrf.mxu0  ;;  %v537_v0 = vpop.f32.mrf.mxu1  ;;  %v588_v33 = vadd.f32 %v557_v61, %v440_v28  ;;  %v589_v34 = vadd.f32 %v580_v62, %v441_v29 }
 0x1ae   : >> { %v590_v35 = vadd.f32 %v514_v63, %v442_v23  ;;  %v591_v36 = vadd.f32 %v537_v0, %v443_v32 }
 0x1b4   : >> { %v560_v17 = vpop.f32.mrf.mxu2  ;;  %v583_v18 = vpop.f32.mrf.mxu3 }
 0x1b5   : >> { %v659_v19 = vpop.f32.mrf.mxu0  ;;  %v682_v20 = vpop.f32.mrf.mxu1  ;;  %v592_v51 = vadd.f32 %v560_v17, %v444_v49  ;;  %v593_v52 = vadd.f32 %v583_v18, %v445_v50 }
 0x1b6   : >> { %v734_v21 = vadd.f32 %v659_v19, %v586_v3  ;;  %v735_v22 = vadd.f32 %v682_v20, %v587_v4 }
 0x1b8   : >> { %v742_v26 = vmax.f32 %v734_v21, 0.0  ;;  %v743_v27 = vmax.f32 %v735_v22, 0.0 }
 0x1ba   : >> { %769 = vmatpush.msrb.mxu0 %v742_v26  ;;  %789 = vmatpush.msrb.mxu1 %v743_v27 }
 0x1bb   : >> { %1122 = vmatmul.msk.f32.vlgmr.msrb.gmra.mxu1 %vm750_vm5, %v1418_v13  ;;  %1121 = vmatmul.msk.f32.vlgmr.msrb.gmra.mxu0 %vm750_vm5, %v1418_v13 }
 0x1bc   : >> { %v705_v39 = vpop.f32.mrf.mxu2  ;;  %v728_v40 = vpop.f32.mrf.mxu3 }
 0x1bd   : >> { %v736_v41 = vadd.f32 %v705_v39, %v588_v33  ;;  %v737_v44 = vadd.f32 %v728_v40, %v589_v34  ;;  %v662_v45 = vpop.f32.mrf.mxu0  ;;  %v685_v25 = vpop.f32.mrf.mxu1 }
 0x1be   : >> { %v738_v30 = vadd.f32 %v662_v45, %v590_v35  ;;  %v739_v46 = vadd.f32 %v685_v25, %v591_v36 }
 0x1bf   : >> { %v744_v47 = vmax.f32 %v736_v41, 0.0  ;;  %v745_v24 = vmax.f32 %v737_v44, 0.0 }
 0x1c0   : >> { %v746_v31 = vmax.f32 %v738_v30, 0.0  ;;  %v747_v48 = vmax.f32 %v739_v46, 0.0 }
 0x1c1   : >> { %809 = vmatpush.msrb.mxu2 %v744_v47  ;;  %829 = vmatpush.msrb.mxu3 %v745_v24 }
 0x1c2   : >> { %849 = vmatpush.msra.mxu0 %v746_v31  ;;  %869 = vmatpush.msra.mxu1 %v747_v48 }
 0x1c3   : >> { %1123 = vmatmul.msk.f32.vlgmr.msrb.gmra.mxu2 %vm750_vm5, %v1418_v13  ;;  %1124 = vmatmul.msk.f32.vlgmr.msrb.gmra.mxu3 %vm750_vm5, %v1418_v13 }
 0x1c4   : >> { %v708_v37 = vpop.f32.mrf.mxu2  ;;  %v731_v43 = vpop.f32.mrf.mxu3  ;;  %1126 = vmatmul.msk.f32.vlgmr.msra.gmra.mxu1 %vm750_vm5, %v1418_v13  ;;  %1125 = vmatmul.msk.f32.vlgmr.msra.gmra.mxu0 %vm750_vm5, %v1418_v13 }
 0x1c5   : >> { %v740_v38 = vadd.f32 %v708_v37, %v592_v51  ;;  %v741_v42 = vadd.f32 %v731_v43, %v593_v52 }
 0x1c7   : >> { %v748_v53 = vmax.f32 %v740_v38, 0.0  ;;  %v749_v54 = vmax.f32 %v741_v42, 0.0 }
 0x1c9   : >> { %889 = vmatpush.msra.mxu2 %v748_v53  ;;  %909 = vmatpush.msra.mxu3 %v749_v54 }
 0x1cb   : >> { %1127 = vmatmul.msk.f32.vlgmr.msra.gmra.mxu2 %vm750_vm5, %v1418_v13  ;;  %1128 = vmatmul.msk.f32.vlgmr.msra.gmra.mxu3 %vm750_vm5, %v1418_v13 }
 0x238   : >> { %v791_v55 = vpop.f32.mrf.mxu1  ;;  %v771_v56 = vpop.f32.mrf.mxu0 }
 0x239   : >> { %v792_v57 = vadd.f32 %v791_v55, %v1422_v15  ;;  %v772_v59 = vadd.f32 %v771_v56, %v1422_v15 }
 0x23b   : >> { %v919_v58 = vrot.slane %v792_v57, 6 }
 0x23d   : >> { %v923_v3 = vsel %vm922_vm6, %v772_v59, %v919_v58 }
 0x241   : >> { %v871_v60 = vpop.f32.mrf.mxu1  ;;  %v851_v17 = vpop.f32.mrf.mxu0 }
 0x242   : >> { %v872_v4 = vadd.f32 %v871_v60, %v1422_v15  ;;  %v852_v21 = vadd.f32 %v851_v17, %v1422_v15 }
 0x244   : >> { %v938_v20 = vrot.slane %v872_v4, 6 }
 0x246   : >> { %v811_v61 = vpop.f32.mrf.mxu2  ;;  %v831_v62 = vpop.f32.mrf.mxu3  ;;  %v941_v32 = vsel %vm922_vm6, %v852_v21, %v938_v20 }
 0x247   : >> { %v812_v63 = vadd.f32 %v811_v61, %v1422_v15  ;;  %v832_v0 = vadd.f32 %v831_v62, %v1422_v15 }
 0x249   : >> { %v920_v1 = vrot.slane %v812_v63, 4  ;;  %v921_v2 = vrot.slane %v832_v0, 2 }
 0x24b   : >> { %v925_v18 = vsel %vm924_vm7, %v920_v1, %v921_v2 }
 0x24c   : >> { %v927_v19 = vsel %vm926_vm8, %v923_v3, %v925_v18 }
 0x24d   : >> { %932 = vst [vmem:[%s931_s29] sm:$0xff] %v927_v19 }
 0x24e   : >> { %v891_v22 = vpop.f32.mrf.mxu2  ;;  %v911_v23 = vpop.f32.mrf.mxu3 }
 0x24f   : >> { %v892_v26 = vadd.f32 %v891_v22, %v1422_v15  ;;  %v912_v27 = vadd.f32 %v911_v23, %v1422_v15 }
 0x251   : >> { %v939_v28 = vrot.slane %v892_v26, 4  ;;  %v940_v29 = vrot.slane %v912_v27, 2  ;;  %292 = sbr.rel (!%p290_p7) target bundleno = 139 (0x8b), region = 82 }
 0x253   : >> { %v942_v33 = vsel %vm924_vm7, %v939_v28, %v940_v29 }
 0x254   : >> { %v943_v34 = vsel %vm926_vm8, %v941_v32, %v942_v33 }
 0x255   : >> { %1134 = vst [vmem:[%s931_s29 + $0x8] sm:$0xff] %v943_v34 }
 0x256 PF: > { %s15_s22 = sadd.s32 1, %s1289_s22   ;;  %s1677_s18 = smov %s1281_s20 }
 0x257   : > { %p12_p8 = scmp.ge.s32.totalorder %s15_s22, 6   ;;  %s1678_s19 = smov %s1285_s21 }
 0x258   : > { %s1679_s20 = smov %s1682_s23  ;;  %s1680_s21 = smov %s1686_s24 }
 0x259   :  { %14 = sbr.rel (!%p12_p8) target bundleno = 3 (0x3), region = 93 }

</bundles_post_ra>
